<compile_context>
chip_gen: v5e
topology: v5e:2x2
jax: 0.10.0
libtpu: 0.0.40
codegen_flags: <defaults>
</compile_context>

<pallas_src>
import functools

import numpy as np
import jax
import jax.numpy as jnp
from jax.experimental import pallas as pl
from jax.experimental.pallas import tpu as pltpu


def _pick_row_stride(H, W):
    """Smallest row stride >= W+2 that makes the output frame H*Wr lane-dense."""
    for cand in range(W + 2, W + 2 + 33):
        if (H * cand) % 128 == 0:
            return cand
    return W + 2          # fallback: correct, just a partial last lane-tile


@functools.partial(jax.jit, static_argnames=("block_batch",))
def soft_thread_func(x_nchw, w1, b1, w2, b2, *, block_batch=8):
    """Forward pass of SoftThreadFunc.

    x_nchw: (N, C, H, W) float32 (PyTorch NCHW convention)
    w1, w2: (3, 3, C, C) float32 (HWIO)
    b1, b2: (1, C) float32
    returns (N, C, H, W) float32
    """
    N, C, H, W = x_nchw.shape
    Wr = _pick_row_stride(H, W)     # common row stride of all flattened frames
    Hp = H + 2
    F = H * Wr                      # conv_2 output frame (cols W..Wr-1 are junk)
    G = Hp * Wr + 2                 # conv_1 wide frame == conv_2 padded-input len
    L = (H + 6) * Wr                # flattened padded-input length per image

    # 3x3 tap offsets as pure lane offsets.
    off1 = [[(dy + 1) * Wr + dx - 1 for dx in range(3)] for dy in range(3)]  # conv_1
    off2 = [[dy * Wr + dx for dx in range(3)] for dy in range(3)]            # conv_2
    assert off1[2][2] + G <= L, "conv_1 tap reads past the input slab"
    assert off2[2][2] + F <= G, "conv_2 tap reads past the wide frame"

    # Images per grid step; keep >= 2 grid steps when possible (v7x has 2 TCs).
    if N >= 2:
        B = max(1, min(block_batch, N // 2))
    else:
        B = 1
    n_steps = -(-N // B)
    N_pad = n_steps * B

    # ---- wrapper-side prep: ONE pad + reshape + cast ------------------------
    # Rows padded (3,3), cols (1, Wr-W-1): flattening this directly yields the
    # shifted, zero-extended frame conv_1 needs (no second pad).
    x_ext = jnp.pad(x_nchw, ((0, N_pad - N), (0, 0), (3, 3), (1, Wr - W - 1)))
    x_ext = x_ext.reshape(N_pad, C, L).astype(jnp.bfloat16)       # (N_pad, C, L)

    # Weights: HWIO (3,3,Cin,Cout) -> (dy, Cout, 3*Cin) so each per-dy chunk is
    # an aligned leading-index slice; bf16 for the MXU.
    def to_mat(w):
        return jnp.transpose(w, (0, 3, 1, 2)).reshape(3, C, 3 * C).astype(jnp.bfloat16)

    w1m, w2m = to_mat(w1), to_mat(w2)
    b1c = b1.reshape(C, 1).astype(jnp.float32)
    b2c = b2.reshape(C, 1).astype(jnp.float32)

    # Compile-time interior mask over the wide frame: 1 on valid pixels of the
    # padded (Hp, Wr) grid, 0 on the border / junk / overhang columns.
    g = np.arange(G)
    keep = (g // Wr >= 1) & (g // Wr <= H) & (g % Wr >= 1) & (g % Wr <= W)
    mask = jnp.asarray(keep.astype(np.float32)).reshape(1, G)

    def kernel(x_ref, mask_ref, w1_ref, b1_ref, w2_ref, b2_ref, o_ref):
        msk = mask_ref[...] > 0.0          # (1, G) bool, broadcast over channels
        bias1 = b1_ref[...]                # (C, 1)
        bias2 = b2_ref[...]                # (C, 1)
        for b in range(B):                 # B is small (<= block_batch), unrolled
            xb = x_ref[b]                  # (C, L) bf16, loaded once per image

            # ---- conv_1: 3 accumulating K=3C dots (one per dy) --------------
            a1 = None
            for dy in range(3):
                col = jnp.concatenate(
                    [xb[:, off1[dy][dx]:off1[dy][dx] + G] for dx in range(3)],
                    axis=0)                                        # (3C, G) bf16
                p = jnp.dot(w1_ref[dy], col,
                            preferred_element_type=jnp.float32)    # (C, G) f32
                a1 = p if a1 is None else a1 + p
            a1 = jnp.maximum(a1 + bias1, 0.0)
            # Zero border/junk columns (NaN/Inf-robust): a1 now IS conv_2's
            # zero-padded input, kept entirely on-chip.
            a1 = jnp.where(msk, a1, 0.0).astype(jnp.bfloat16)      # (C, G)

            # ---- conv_2: same per-dy structure over a1 -----------------------
            a2 = None
            for dy in range(3):
                col = jnp.concatenate(
                    [a1[:, off2[dy][dx]:off2[dy][dx] + F] for dx in range(3)],
                    axis=0)                                        # (3C, F) bf16
                p = jnp.dot(w2_ref[dy], col,
                            preferred_element_type=jnp.float32)    # (C, F) f32
                a2 = p if a2 is None else a2 + p
            o_ref[b] = (a2 + bias2).astype(o_ref.dtype)            # lane-dense store

    # VMEM budget from the actual double-buffered blocks; cap v7x-safe (64 MiB).
    in_bytes = B * C * L * 2
    out_bytes = B * C * F * 4
    fixed = 2 * (3 * C * 3 * C) * 2 + 2 * C * 4 + G * 4
    vmem_need = 2 * (in_bytes + out_bytes) + fixed + (2 << 20)
    vmem_limit = int(min(max(vmem_need, 16 << 20), 48 << 20))

    out = pl.pallas_call(
        kernel,
        out_shape=jax.ShapeDtypeStruct((N_pad, C, F), jnp.float32),
        grid_spec=pltpu.PrefetchScalarGridSpec(
            num_scalar_prefetch=0,
            grid=(n_steps,),
            in_specs=[
                pl.BlockSpec((B, C, L), lambda s: (s, 0, 0)),          # image slab
                pl.BlockSpec((1, G), lambda s: (0, 0)),                # border mask
                pl.BlockSpec((3, C, 3 * C), lambda s: (0, 0, 0)),      # w1 (dy,Co,3Ci)
                pl.BlockSpec((C, 1), lambda s: (0, 0)),                # b1
                pl.BlockSpec((3, C, 3 * C), lambda s: (0, 0, 0)),      # w2
                pl.BlockSpec((C, 1), lambda s: (0, 0)),                # b2
            ],
            out_specs=pl.BlockSpec((B, C, F), lambda s: (s, 0, 0)),
        ),
        compiler_params=pltpu.CompilerParams(
            dimension_semantics=("parallel",),
            vmem_limit_bytes=vmem_limit,
        ),
    )(x_ext, mask, w1m, b1c, w2m, b2c)

    # Strip batch padding + the junk columns per row (free reshape + cheap slice).
    return out[:N].reshape(N, C, H, Wr)[:, :, :, :W]


def _reference(x_nchw, w1, b1, w2, b2):
    """Pure-JAX reference using lax.conv (NHWC / HWIO / SAME)."""
    C = x_nchw.shape[1]
    dn = ("NHWC", "HWIO", "NHWC")
    xh = jnp.transpose(x_nchw, (0, 2, 3, 1))
    y = jax.lax.conv_general_dilated(
        xh, w1, (1, 1), "SAME", dimension_numbers=dn
    ) + b1.reshape(1, 1, 1, C)
    y = jnp.maximum(y, 0.0)
    y = jax.lax.conv_general_dilated(
        y, w2, (1, 1), "SAME", dimension_numbers=dn
    ) + b2.reshape(1, 1, 1, C)
    return jnp.transpose(y, (0, 3, 1, 2))


if __name__ == "__main__":
    N, C, H, W = 2, 32, 16, 16      # channels fixed at 32 by the module
    key = jax.random.PRNGKey(0)
    k_x, k_w1, k_b1, k_w2, k_b2 = jax.random.split(key, 5)

    x = jax.random.normal(k_x, (N, C, H, W), jnp.float32)

    # Deterministic PyTorch-Conv2d-style init: U(-1/sqrt(fan_in), 1/sqrt(fan_in))
    fan_in = C * 3 * 3
    bound = 1.0 / float(np.sqrt(fan_in))
    w1 = jax.random.uniform(k_w1, (3, 3, C, C), jnp.float32, -bound, bound)
    b1 = jax.random.uniform(k_b1, (1, C), jnp.float32, -bound, bound)
    w2 = jax.random.uniform(k_w2, (3, 3, C, C), jnp.float32, -bound, bound)
    b2 = jax.random.uniform(k_b2, (1, C), jnp.float32, -bound, bound)

    out = jax.block_until_ready(soft_thread_func(x, w1, b1, w2, b2))
    ref = jax.block_until_ready(_reference(x, w1, b1, w2, b2))

    # bf16 MXU operands (f32 accumulation) -> ~1e-2 relative parity vs f32 conv.
    np.testing.assert_allclose(np.asarray(out), np.asarray(ref),
                               rtol=2e-2, atol=2e-2)

    print("KERNEL_OK")
</pallas_src>

<mosaic_0001>
module attributes {stable_mosaic.version = 11 : i64} {
  func.func @kernel(%arg0: i32, %arg1: memref<1x32x528xbf16, #tpu.memory_space<vmem>>, %arg2: memref<1x434xf32, #tpu.memory_space<vmem>>, %arg3: memref<3x32x96xbf16, #tpu.memory_space<vmem>>, %arg4: memref<32x1xf32, #tpu.memory_space<vmem>>, %arg5: memref<3x32x96xbf16, #tpu.memory_space<vmem>>, %arg6: memref<32x1xf32, #tpu.memory_space<vmem>>, %arg7: memref<1x32x384xf32, #tpu.memory_space<vmem>>) attributes {dimension_semantics = [#tpu.dimension_semantics<parallel>], iteration_bounds = array<i64: 2>, scalar_prefetch = 0 : i64, scratch_operands = 0 : i64, tpu.core_type = #tpu.core_type<tc>, window_params = [{transform_indices = @transform_0, window_bounds = array<i64: 1, 32, 528>}, {pipeline_mode = #tpu.pipeline_mode<synchronous>, transform_indices = @transform_1, window_bounds = array<i64: 1, 434>}, {pipeline_mode = #tpu.pipeline_mode<synchronous>, transform_indices = @transform_2, window_bounds = array<i64: 3, 32, 96>}, {pipeline_mode = #tpu.pipeline_mode<synchronous>, transform_indices = @transform_3, window_bounds = array<i64: 32, 1>}, {pipeline_mode = #tpu.pipeline_mode<synchronous>, transform_indices = @transform_4, window_bounds = array<i64: 3, 32, 96>}, {pipeline_mode = #tpu.pipeline_mode<synchronous>, transform_indices = @transform_5, window_bounds = array<i64: 32, 1>}, {transform_indices = @transform_6, window_bounds = array<i64: 1, 32, 384>}]} {
    %c0 = arith.constant 0 : index
    %c0_0 = arith.constant 0 : index
    %0 = vector.load %arg2[%c0, %c0_0] : memref<1x434xf32, #tpu.memory_space<vmem>>, vector<1x434xf32>
    %cst = arith.constant 0.000000e+00 : f32
    %1 = vector.broadcast %cst : f32 to vector<1x434xf32>
    %2 = arith.cmpf ogt, %0, %1 : vector<1x434xf32>
    %c0_1 = arith.constant 0 : index
    %c0_2 = arith.constant 0 : index
    %3 = vector.load %arg4[%c0_1, %c0_2] : memref<32x1xf32, #tpu.memory_space<vmem>>, vector<32x1xf32>
    %c0_3 = arith.constant 0 : index
    %c0_4 = arith.constant 0 : index
    %4 = vector.load %arg6[%c0_3, %c0_4] : memref<32x1xf32, #tpu.memory_space<vmem>>, vector<32x1xf32>
    %c0_5 = arith.constant 0 : index
    %c0_6 = arith.constant 0 : index
    %c0_7 = arith.constant 0 : index
    %5 = vector.load %arg1[%c0_5, %c0_6, %c0_7] : memref<1x32x528xbf16, #tpu.memory_space<vmem>>, vector<1x32x528xbf16>
    %6 = vector.shape_cast %5 : vector<1x32x528xbf16> to vector<32x528xbf16>
    %7 = vector.extract_strided_slice %6 {offsets = [0, 23], sizes = [32, 434], strides = [1, 1]} : vector<32x528xbf16> to vector<32x434xbf16>
    %8 = vector.extract_strided_slice %6 {offsets = [0, 24], sizes = [32, 434], strides = [1, 1]} : vector<32x528xbf16> to vector<32x434xbf16>
    %9 = vector.extract_strided_slice %6 {offsets = [0, 25], sizes = [32, 434], strides = [1, 1]} : vector<32x528xbf16> to vector<32x434xbf16>
    %10 = tpu.concatenate %7, %8, %9 in 0 : vector<32x434xbf16>, vector<32x434xbf16>, vector<32x434xbf16> -> vector<96x434xbf16>
    %c0_8 = arith.constant 0 : index
    %c0_9 = arith.constant 0 : index
    %c0_10 = arith.constant 0 : index
    %11 = vector.load %arg3[%c0_8, %c0_9, %c0_10] : memref<3x32x96xbf16, #tpu.memory_space<vmem>>, vector<1x32x96xbf16>
    %12 = vector.shape_cast %11 : vector<1x32x96xbf16> to vector<32x96xbf16>
    %cst_11 = arith.constant dense<0.000000e+00> : vector<32x434xf32>
    %13 = tpu.matmul %12, %10, %cst_11 {dimension_numbers = #tpu.dot_dimension_numbers<[1], [0], [0], [1], [0, 0, 1, 1], [], []>} : vector<32x96xbf16>, vector<96x434xbf16>, vector<32x434xf32> -> vector<32x434xf32>
    %14 = vector.extract_strided_slice %6 {offsets = [0, 47], sizes = [32, 434], strides = [1, 1]} : vector<32x528xbf16> to vector<32x434xbf16>
    %15 = vector.extract_strided_slice %6 {offsets = [0, 48], sizes = [32, 434], strides = [1, 1]} : vector<32x528xbf16> to vector<32x434xbf16>
    %16 = vector.extract_strided_slice %6 {offsets = [0, 49], sizes = [32, 434], strides = [1, 1]} : vector<32x528xbf16> to vector<32x434xbf16>
    %17 = tpu.concatenate %14, %15, %16 in 0 : vector<32x434xbf16>, vector<32x434xbf16>, vector<32x434xbf16> -> vector<96x434xbf16>
    %c1 = arith.constant 1 : index
    %c0_12 = arith.constant 0 : index
    %c0_13 = arith.constant 0 : index
    %18 = vector.load %arg3[%c1, %c0_12, %c0_13] : memref<3x32x96xbf16, #tpu.memory_space<vmem>>, vector<1x32x96xbf16>
    %19 = vector.shape_cast %18 : vector<1x32x96xbf16> to vector<32x96xbf16>
    %cst_14 = arith.constant dense<0.000000e+00> : vector<32x434xf32>
    %20 = tpu.matmul %19, %17, %cst_14 {dimension_numbers = #tpu.dot_dimension_numbers<[1], [0], [0], [1], [0, 0, 1, 1], [], []>} : vector<32x96xbf16>, vector<96x434xbf16>, vector<32x434xf32> -> vector<32x434xf32>
    %21 = arith.addf %13, %20 : vector<32x434xf32>
    %22 = vector.extract_strided_slice %6 {offsets = [0, 71], sizes = [32, 434], strides = [1, 1]} : vector<32x528xbf16> to vector<32x434xbf16>
    %23 = vector.extract_strided_slice %6 {offsets = [0, 72], sizes = [32, 434], strides = [1, 1]} : vector<32x528xbf16> to vector<32x434xbf16>
    %24 = vector.extract_strided_slice %6 {offsets = [0, 73], sizes = [32, 434], strides = [1, 1]} : vector<32x528xbf16> to vector<32x434xbf16>
    %25 = tpu.concatenate %22, %23, %24 in 0 : vector<32x434xbf16>, vector<32x434xbf16>, vector<32x434xbf16> -> vector<96x434xbf16>
    %c2 = arith.constant 2 : index
    %c0_15 = arith.constant 0 : index
    %c0_16 = arith.constant 0 : index
    %26 = vector.load %arg3[%c2, %c0_15, %c0_16] : memref<3x32x96xbf16, #tpu.memory_space<vmem>>, vector<1x32x96xbf16>
    %27 = vector.shape_cast %26 : vector<1x32x96xbf16> to vector<32x96xbf16>
    %cst_17 = arith.constant dense<0.000000e+00> : vector<32x434xf32>
    %28 = tpu.matmul %27, %25, %cst_17 {dimension_numbers = #tpu.dot_dimension_numbers<[1], [0], [0], [1], [0, 0, 1, 1], [], []>} : vector<32x96xbf16>, vector<96x434xbf16>, vector<32x434xf32> -> vector<32x434xf32>
    %29 = arith.addf %21, %28 : vector<32x434xf32>
    %30 = vector.broadcast %3 : vector<32x1xf32> to vector<32x434xf32>
    %31 = arith.addf %29, %30 : vector<32x434xf32>
    %cst_18 = arith.constant 0.000000e+00 : f32
    %32 = vector.broadcast %cst_18 : f32 to vector<32x434xf32>
    %33 = arith.maximumf %31, %32 : vector<32x434xf32>
    %cst_19 = arith.constant 0.000000e+00 : f32
    %34 = vector.shape_cast %2 : vector<1x434xi1> to vector<1x434xi1>
    %35 = vector.broadcast %34 : vector<1x434xi1> to vector<32x434xi1>
    %36 = vector.broadcast %cst_19 : f32 to vector<32x434xf32>
    %37 = arith.select %35, %33, %36 : vector<32x434xi1>, vector<32x434xf32>
    %38 = arith.truncf %37 : vector<32x434xf32> to vector<32x434xbf16>
    %39 = vector.extract_strided_slice %38 {offsets = [0, 0], sizes = [32, 384], strides = [1, 1]} : vector<32x434xbf16> to vector<32x384xbf16>
    %40 = vector.extract_strided_slice %38 {offsets = [0, 1], sizes = [32, 384], strides = [1, 1]} : vector<32x434xbf16> to vector<32x384xbf16>
    %41 = vector.extract_strided_slice %38 {offsets = [0, 2], sizes = [32, 384], strides = [1, 1]} : vector<32x434xbf16> to vector<32x384xbf16>
    %42 = tpu.concatenate %39, %40, %41 in 0 : vector<32x384xbf16>, vector<32x384xbf16>, vector<32x384xbf16> -> vector<96x384xbf16>
    %c0_20 = arith.constant 0 : index
    %c0_21 = arith.constant 0 : index
    %c0_22 = arith.constant 0 : index
    %43 = vector.load %arg5[%c0_20, %c0_21, %c0_22] : memref<3x32x96xbf16, #tpu.memory_space<vmem>>, vector<1x32x96xbf16>
    %44 = vector.shape_cast %43 : vector<1x32x96xbf16> to vector<32x96xbf16>
    %cst_23 = arith.constant dense<0.000000e+00> : vector<32x384xf32>
    %45 = tpu.matmul %44, %42, %cst_23 {dimension_numbers = #tpu.dot_dimension_numbers<[1], [0], [0], [1], [0, 0, 1, 1], [], []>} : vector<32x96xbf16>, vector<96x384xbf16>, vector<32x384xf32> -> vector<32x384xf32>
    %46 = vector.extract_strided_slice %38 {offsets = [0, 24], sizes = [32, 384], strides = [1, 1]} : vector<32x434xbf16> to vector<32x384xbf16>
    %47 = vector.extract_strided_slice %38 {offsets = [0, 25], sizes = [32, 384], strides = [1, 1]} : vector<32x434xbf16> to vector<32x384xbf16>
    %48 = vector.extract_strided_slice %38 {offsets = [0, 26], sizes = [32, 384], strides = [1, 1]} : vector<32x434xbf16> to vector<32x384xbf16>
    %49 = tpu.concatenate %46, %47, %48 in 0 : vector<32x384xbf16>, vector<32x384xbf16>, vector<32x384xbf16> -> vector<96x384xbf16>
    %c1_24 = arith.constant 1 : index
    %c0_25 = arith.constant 0 : index
    %c0_26 = arith.constant 0 : index
    %50 = vector.load %arg5[%c1_24, %c0_25, %c0_26] : memref<3x32x96xbf16, #tpu.memory_space<vmem>>, vector<1x32x96xbf16>
    %51 = vector.shape_cast %50 : vector<1x32x96xbf16> to vector<32x96xbf16>
    %cst_27 = arith.constant dense<0.000000e+00> : vector<32x384xf32>
    %52 = tpu.matmul %51, %49, %cst_27 {dimension_numbers = #tpu.dot_dimension_numbers<[1], [0], [0], [1], [0, 0, 1, 1], [], []>} : vector<32x96xbf16>, vector<96x384xbf16>, vector<32x384xf32> -> vector<32x384xf32>
    %53 = arith.addf %45, %52 : vector<32x384xf32>
    %54 = vector.extract_strided_slice %38 {offsets = [0, 48], sizes = [32, 384], strides = [1, 1]} : vector<32x434xbf16> to vector<32x384xbf16>
    %55 = vector.extract_strided_slice %38 {offsets = [0, 49], sizes = [32, 384], strides = [1, 1]} : vector<32x434xbf16> to vector<32x384xbf16>
    %56 = vector.extract_strided_slice %38 {offsets = [0, 50], sizes = [32, 384], strides = [1, 1]} : vector<32x434xbf16> to vector<32x384xbf16>
    %57 = tpu.concatenate %54, %55, %56 in 0 : vector<32x384xbf16>, vector<32x384xbf16>, vector<32x384xbf16> -> vector<96x384xbf16>
    %c2_28 = arith.constant 2 : index
    %c0_29 = arith.constant 0 : index
    %c0_30 = arith.constant 0 : index
    %58 = vector.load %arg5[%c2_28, %c0_29, %c0_30] : memref<3x32x96xbf16, #tpu.memory_space<vmem>>, vector<1x32x96xbf16>
    %59 = vector.shape_cast %58 : vector<1x32x96xbf16> to vector<32x96xbf16>
    %cst_31 = arith.constant dense<0.000000e+00> : vector<32x384xf32>
    %60 = tpu.matmul %59, %57, %cst_31 {dimension_numbers = #tpu.dot_dimension_numbers<[1], [0], [0], [1], [0, 0, 1, 1], [], []>} : vector<32x96xbf16>, vector<96x384xbf16>, vector<32x384xf32> -> vector<32x384xf32>
    %61 = arith.addf %53, %60 : vector<32x384xf32>
    %62 = vector.broadcast %4 : vector<32x1xf32> to vector<32x384xf32>
    %63 = arith.addf %61, %62 : vector<32x384xf32>
    %c0_32 = arith.constant 0 : index
    %c0_33 = arith.constant 0 : index
    %c0_34 = arith.constant 0 : index
    %64 = vector.load %arg7[%c0_32, %c0_33, %c0_34] : memref<1x32x384xf32, #tpu.memory_space<vmem>>, vector<1x32x384xf32>
    %65 = vector.shape_cast %64 : vector<1x32x384xf32> to vector<32x384xf32>
    %66 = vector.shape_cast %63 : vector<32x384xf32> to vector<1x32x384xf32>
    tpu.vector_store %arg7[%c0_32, %c0_33, %c0_34], %66 {strides = array<i32>} : memref<1x32x384xf32, #tpu.memory_space<vmem>>, vector<1x32x384xf32>,
    return
  }
  func.func @transform_0(%arg0: i32) -> (i32, i32, i32) {
    %c0_i32 = arith.constant 0 : i32
    %c0_i32_0 = arith.constant 0 : i32
    %c0_i32_1 = arith.constant 0 : i32
    return %arg0, %c0_i32, %c0_i32_0 : i32, i32, i32
  }
  func.func @transform_1(%arg0: i32) -> (i32, i32) {
    %c0_i32 = arith.constant 0 : i32
    %c0_i32_0 = arith.constant 0 : i32
    %c0_i32_1 = arith.constant 0 : i32
    return %c0_i32, %c0_i32_0 : i32, i32
  }
  func.func @transform_2(%arg0: i32) -> (i32, i32, i32) {
    %c0_i32 = arith.constant 0 : i32
    %c0_i32_0 = arith.constant 0 : i32
    %c0_i32_1 = arith.constant 0 : i32
    %c0_i32_2 = arith.constant 0 : i32
    return %c0_i32, %c0_i32_0, %c0_i32_1 : i32, i32, i32
  }
  func.func @transform_3(%arg0: i32) -> (i32, i32) {
    %c0_i32 = arith.constant 0 : i32
    %c0_i32_0 = arith.constant 0 : i32
    %c0_i32_1 = arith.constant 0 : i32
    return %c0_i32, %c0_i32_0 : i32, i32
  }
  func.func @transform_4(%arg0: i32) -> (i32, i32, i32) {
    %c0_i32 = arith.constant 0 : i32
    %c0_i32_0 = arith.constant 0 : i32
    %c0_i32_1 = arith.constant 0 : i32
    %c0_i32_2 = arith.constant 0 : i32
    return %c0_i32, %c0_i32_0, %c0_i32_1 : i32, i32, i32
  }
  func.func @transform_5(%arg0: i32) -> (i32, i32) {
    %c0_i32 = arith.constant 0 : i32
    %c0_i32_0 = arith.constant 0 : i32
    %c0_i32_1 = arith.constant 0 : i32
    return %c0_i32, %c0_i32_0 : i32, i32
  }
  func.func @transform_6(%arg0: i32) -> (i32, i32, i32) {
    %c0_i32 = arith.constant 0 : i32
    %c0_i32_0 = arith.constant 0 : i32
    %c0_i32_1 = arith.constant 0 : i32
    return %arg0, %c0_i32, %c0_i32_0 : i32, i32, i32
  }
}

</mosaic_0001>

<bundles_post_ra>
// kernel: soft_thread_func.1
= control target key start
LH: loop header
LB: loop body
LE: loop exit
PB: predicated region body
PF: predicated region fallthrough
CT: control target
= control target key end

     0   :  { %s1867_s21 = smov 0   ;;  %s2717_s0 = inlined_call_operand.vmem [shape: bf16[2,32,528], index: 0, kind: input, shape index: {}]   ;;  %s2718_s1 = inlined_call_operand.vmem [shape: f32[1,434], index: 1, kind: input, shape index: {}]   ;;  %s2719_s2 = inlined_call_operand.vmem [shape: bf16[3,32,96], index: 2, kind: input, shape index: {}]   ;;  %s2720_s3 = inlined_call_operand.vmem [shape: f32[32,1], index: 3, kind: input, shape index: {}]   ;;  %s2721_s4 = inlined_call_operand.vmem [shape: bf16[3,32,96], index: 4, kind: input, shape index: {}]   ;;  %s2722_s5 = inlined_call_operand.vmem [shape: f32[32,1], index: 5, kind: input, shape index: {}]   ;;  %s2723_s6 = inlined_call_operand.vmem [shape: f32[2,32,384], index: 6, kind: output, shape index: {}]  }
   0x1 LB: > { %s1622_s22 = sadd.s32 4294967295, %s1822_s21   ;;  %p1626_p0 = scmp.ge.s32.totalorder %s1822_s21, 1  ;;  %s1822_s21 = sphi %s1867_s21, %s16_s21  }
   0x2   : > { %p212_p1 = scmp.lt.s32.totalorder %s1822_s21, 3 }
   0x4   : > { %p213_p2 = pnand %p1626_p0, %p212_p1 }
   0x5   : > { %p242_p3 = scmp.lt.s32.totalorder (!%p213_p2), %s1622_s22, 1  ;;  %s1824_s27 = smov (!%p213_p2), 126  }
   0x6   : > { %216 = sbr.rel (%p213_p2) target bundleno = 1081 (0x439), region = 44  ;;  %s1825_s28 = smov (!%p213_p2), 127  }
   0x7   : > { %s1826_s29 = smov (!%p213_p2), 81   ;;  %s1827_s30 = smov (!%p213_p2), 105  }
   0x8   : > { %s1828_s7 = smov (!%p213_p2), 57   ;;  %s1830_s10 = smov (!%p213_p2), 104  }
   0xb   : > { %s2733_s22 = smov (!%p242_p3, %s1622_s22), 1  ;;  %vm342_vm0 = vcmask 1031168   ;;  %vm319_vm1 = vcmask 1039360   ;;  %vm416_vm2 = vcmask 662528   ;;  %vm459_vm3 = vcmask 785408  }
   0xc   : > { %s1795_s23 = smul.u32 80, %s2733_s22  ;;  %vm600_vm4 = vcmask 859136   ;;  %vm788_vm5 = vcmask 465920   ;;  %vm1175_vm11 = vcmask 850944   ;;  %vm1411_vm12 = vcmask 654336  }
   0xe   : > { %s1881_s26 = scalar_lea.vmem %s2717_s0, %s1795_s23 }
   0xf   : > { %v1655_v0 = vld [vmem:[%s1881_s26 + $0x30] sm:$0xf]  ;;  %v1776_v1 = vld [vmem:[%s1881_s26 + $0x40] sm:$0xf0]  ;;  %v1639_v2 = vld [vmem:[%s1881_s26 + $0x8] sm:$0xf] }
  0x10   : > { %v1886_v3 = vor.u32 %v1776_v1, %v1655_v0  ;;  %v1772_v4 = vld [vmem:[%s1881_s26 + $0x18] sm:$0xf0]  ;;  %v1647_v5 = vld [vmem:[%s1881_s26 + $0x28] sm:$0xf]  ;;  %v1774_v9 = vld [vmem:[%s1881_s26 + $0x34] sm:$0xf] }
  0x11   : > { %v1775_v6 = vld [vmem:[%s1881_s26 + $0x38] sm:$0xf0]  ;;  %v1891_v7 = vor.u32 %v1772_v4, %v1639_v2  ;;  %v1657_v10 = vld [vmem:[%s1881_s26 + $0x44] sm:$0xf0]  ;;  %v1770_v11 = vld [vmem:[%s1881_s26 + $0xc] sm:$0xf] }
  0x12   : > { %v1893_v8 = vor.u32 %v1775_v6, %v1647_v5  ;;  %338 = vrot.lane.b32.xlu0 %v1886_v3, %s1824_s27  ;;  %v1641_v12 = vld [vmem:[%s1881_s26 + $0x1c] sm:$0xf0]  ;;  %v1773_v13 = vld [vmem:[%s1881_s26 + $0x2c] sm:$0xf]  ;;  %v1907_v15 = vor.u32 %v1774_v9, %v1657_v10  ;;  %v1771_v19 = vld [vmem:[%s1881_s26 + $0x10] sm:$0xf0] }
  0x13   : > { %330 = vrot.lane.b32.xlu1 %v1891_v7, %s1824_s27  ;;  %v1649_v14 = vld [vmem:[%s1881_s26 + $0x3c] sm:$0xf0]  ;;  %v1909_v16 = vor.u32 %v1770_v11, %v1641_v12  ;;  %v1769_v21 = vld [vmem:[%s1881_s26 + $0x4] sm:$0xf]  ;;  %v1633_v22 = vld [vmem:[%s1881_s26 + $0x14] sm:$0xf0] }
  0x14   : > { %334 = vrot.lane.b32.xlu2 %v1893_v8, %s1824_s27  ;;  %v1911_v17 = vor.u32 %v1773_v13, %v1649_v14  ;;  %v1631_v18 = vld [vmem:[%s1881_s26] sm:$0xf]  ;;  %v1931_v23 = vor.u32 %v1769_v21, %v1633_v22 }
  0x15   : > { %v1921_v20 = vor.u32 %v1771_v19, %v1631_v18 }
  0x1a   : > { %340 = vrot.lane.b32.xlu0 %v1907_v15, %s1824_s27 }
  0x1b   : > { %332 = vrot.lane.b32.xlu1 %v1909_v16, %s1824_s27 }
  0x1c   : > { %336 = vrot.lane.b32.xlu2 %v1911_v17, %s1824_s27 }
  0x22   : > { %315 = vrot.lane.b32.xlu0 %v1886_v3, %s1825_s28 }
  0x23   : > { %317 = vrot.lane.b32.xlu1 %v1907_v15, %s1825_s28 }
  0x24   : > { %326 = vrot.lane.b32.xlu2 %v1921_v20, %s1824_s27 }
  0x2a   : > { %328 = vrot.lane.b32.xlu0 %v1931_v23, %s1824_s27 }
  0x2b   : > { %307 = vrot.lane.b32.xlu1 %v1891_v7, %s1825_s28 }
  0x2c   : > { %309 = vrot.lane.b32.xlu2 %v1909_v16, %s1825_s28 }
  0x32   : > { %311 = vrot.lane.b32.xlu0 %v1893_v8, %s1825_s28 }
  0x33   : > { %313 = vrot.lane.b32.xlu1 %v1911_v17, %s1825_s28 }
  0x34   : > { %303 = vrot.lane.b32.xlu2 %v1921_v20, %s1825_s28 }
  0x3a   : > { %305 = vrot.lane.b32.xlu0 %v1931_v23, %s1825_s28 }
  0x3b   : > { %382 = vrot.lane.b32.xlu1 %v1907_v15, %s1826_s29 }
  0x3c   : > { %374 = vrot.lane.b32.xlu2 %v1909_v16, %s1826_s29 }
  0x42   : > { %380 = vrot.lane.b32.xlu0 %v1886_v3, %s1826_s29 }
  0x43   : > { %372 = vrot.lane.b32.xlu1 %v1891_v7, %s1826_s29 }
  0x44   : > { %368 = vrot.lane.b32.xlu2 %v1921_v20, %s1826_s29 }
  0x4a   : > { %376 = vrot.lane.b32.xlu0 %v1893_v8, %s1826_s29 }
  0x4b   : > { %378 = vrot.lane.b32.xlu1 %v1911_v17, %s1826_s29 }
  0x52   : > { %370 = vrot.lane.b32.xlu0 %v1931_v23, %s1826_s29 }
  0x6e   : > { %v335_v24 = vpop.permute.xlu2 %334 }
  0x76   : > { %v337_v25 = vpop.permute.xlu2 %336 }
  0x77   : > { %v2011_v43 = vsel %vm342_vm0, %v335_v24, %v337_v25 }
  0x7e   : > { %v327_v26 = vpop.permute.xlu2 %326 }
  0x84   : > { %v339_v27 = vpop.permute.xlu0 %338 }
  0x85   : > { %v331_v28 = vpop.permute.xlu1 %330  ;;  %v1988_v35 = vsel %vm342_vm0, %v337_v25, %v339_v27 }
  0x86   : > { %v1963_v29 = vpop.permute.xlu2 %309 }
  0x87   : > { %390 = vrot.lane.b32.xlu0 %v1963_v29, %s1826_s29 }
  0x8c   : > { %v1967_v30 = vpop.permute.xlu0 %340 }
  0x8d   : > { %v1969_v31 = vpop.permute.xlu1 %332  ;;  %414 = vrot.lane.b32.xlu2 %v1967_v30, %s1826_s29  ;;  %v348_v37 = vsel %vm342_vm0, %v339_v27, %v1967_v30 }
  0x8e   : > { %406 = vrot.lane.b32.xlu1 %v1969_v31, %s1826_s29  ;;  %v1977_v32 = vsel %vm342_vm0, %v331_v28, %v1969_v31  ;;  %v304_v51 = vpop.permute.xlu2 %303 }
  0x8f   : > { %404 = vrot.lane.b32.xlu0 %v1977_v32, %s1826_s29 }
  0x94   : > { %v316_v33 = vpop.permute.xlu0 %315 }
  0x95   : > { %v1981_v34 = vpop.permute.xlu1 %317 }
  0x96   : > { %590 = vrot.lane.b32.xlu1 %v1969_v31, %s1827_s30  ;;  %398 = vrot.lane.b32.xlu2 %v1981_v34, %s1826_s29  ;;  %v2004_v40 = vsel %vm319_vm1, %v316_v33, %v1981_v34  ;;  %v2061_v55 = vpop.permute.xlu2 %374 }
  0x97   : > { %410 = vrot.lane.b32.xlu0 %v1988_v35, %s1826_s29 }
  0x9c   : > { %v329_v36 = vpop.permute.xlu0 %328 }
  0x9d   : > { %v1995_v38 = vsel %vm342_vm0, %v327_v26, %v329_v36  ;;  %v308_v41 = vpop.permute.xlu1 %307  ;;  %v2014_v44 = vsel %vm342_vm0, %v329_v36, %v331_v28 }
  0x9e   : > { %412 = vrot.lane.b32.xlu1 %v348_v37, %s1826_s29  ;;  %598 = vrot.lane.b32.xlu2 %v1967_v30, %s1827_s30  ;;  %v2027_v47 = vsel %vm319_vm1, %v308_v41, %v1963_v29  ;;  %v369_v59 = vpop.permute.xlu2 %368 }
  0x9f   : > { %400 = vrot.lane.b32.xlu0 %v1995_v38, %s1826_s29 }
  0xa4   : > { %v312_v39 = vpop.permute.xlu0 %311 }
  0xa5   : > { %v314_v46 = vpop.permute.xlu1 %313 }
  0xa6   : > { %396 = vrot.lane.b32.xlu1 %v2004_v40, %s1826_s29  ;;  %582 = vrot.lane.b32.xlu2 %v1981_v34, %s1827_s30  ;;  %v2030_v48 = vsel %vm319_vm1, %v312_v39, %v314_v46  ;;  %v2039_v49 = vsel %vm319_vm1, %v314_v46, %v316_v33 }
  0xac   : > { %v306_v42 = vpop.permute.xlu0 %305 }
  0xad   : > { %v2017_v45 = vsel %vm319_vm1, %v306_v42, %v308_v41  ;;  %v2049_v52 = vsel %vm319_vm1, %v304_v51, %v306_v42  ;;  %v2057_v53 = vpop.permute.xlu1 %382 }
  0xae   : > { %408 = vrot.lane.b32.xlu2 %v2011_v43, %s1826_s29  ;;  %402 = vrot.lane.b32.xlu1 %v2014_v44, %s1826_s29 }
  0xaf   : > { %386 = vrot.lane.b32.xlu0 %v2017_v45, %s1826_s29 }
  0xb4   : > { %v2046_v50 = vpop.permute.xlu0 %380 }
  0xb5   : > { %v2069_v57 = vpop.permute.xlu1 %372 }
  0xb6   : > { %388 = vrot.lane.b32.xlu2 %v2027_v47, %s1826_s29  ;;  %392 = vrot.lane.b32.xlu1 %v2030_v48, %s1826_s29 }
  0xb7   : > { %588 = vrot.lane.b32.xlu0 %v1977_v32, %s1827_s30 }
  0xbc   : > { %v2059_v54 = vpop.permute.xlu0 %376 }
  0xbd   : > { %v2105_v63 = vpop.permute.xlu1 %378 }
  0xbe   : > { %394 = vrot.lane.b32.xlu2 %v2039_v49, %s1826_s29  ;;  %596 = vrot.lane.b32.xlu1 %v348_v37, %s1827_s30 }
  0xbf   : > { %594 = vrot.lane.b32.xlu0 %v1988_v35, %s1827_s30 }
  0xc4   : > { %v371_v56 = vpop.permute.xlu0 %370 }
  0xc5   : > { %v2073_v58 = vsel %vm416_vm2, %v371_v56, %v2069_v57  ;;  %v2080_v60 = vsel %vm416_vm2, %v369_v59, %v371_v56 }
  0xc6   : > { %580 = vrot.lane.b32.xlu1 %v2004_v40, %s1827_s30  ;;  %384 = vrot.lane.b32.xlu2 %v2049_v52, %s1826_s29 }
  0xc7   : > { %584 = vrot.lane.b32.xlu0 %v1995_v38, %s1827_s30 }
  0xce   : > { %586 = vrot.lane.b32.xlu1 %v2014_v44, %s1827_s30  ;;  %592 = vrot.lane.b32.xlu2 %v2011_v43, %s1827_s30 }
  0xcf   : > { %574 = vrot.lane.b32.xlu0 %v1963_v29, %s1827_s30 }
  0xd6   : > { %576 = vrot.lane.b32.xlu1 %v2030_v48, %s1827_s30  ;;  %572 = vrot.lane.b32.xlu2 %v2027_v47, %s1827_s30 }
  0xd7   : > { %564 = vrot.lane.b32.xlu0 %v1886_v3, %s1827_s30 }
  0xde   : > { %566 = vrot.lane.b32.xlu1 %v1907_v15, %s1827_s30  ;;  %578 = vrot.lane.b32.xlu2 %v2039_v49, %s1827_s30 }
  0xdf   : > { %570 = vrot.lane.b32.xlu0 %v2017_v45, %s1827_s30 }
  0xe6   : > { %556 = vrot.lane.b32.xlu1 %v1891_v7, %s1827_s30  ;;  %568 = vrot.lane.b32.xlu2 %v2049_v52, %s1827_s30 }
  0xe7   : > { %560 = vrot.lane.b32.xlu0 %v1893_v8, %s1827_s30  ;;  %v415_v61 = vpop.permute.xlu2 %414 }
  0xe8   : > { %525 = vmatpush.bf16.msra.mxu3 %v415_v61 }
  0xee   : > { %562 = vrot.lane.b32.xlu1 %v1911_v17, %s1827_s30  ;;  %558 = vrot.lane.b32.xlu2 %v1909_v16, %s1827_s30 }
  0xef   : > { %554 = vrot.lane.b32.xlu0 %v1931_v23, %s1827_s30 }
  0xf0   : > { %v399_v62 = vpop.permute.xlu2 %398 }
  0xf6   : > { %784 = vrot.lane.b32.xlu1 %v348_v37, %s1828_s7  ;;  %552 = vrot.lane.b32.xlu2 %v1921_v20, %s1827_s30 }
  0xf7   : > { %776 = vrot.lane.b32.xlu0 %v1977_v32, %s1828_s7  ;;  %v419_v32 = vsel %vm416_vm2, %v2069_v57, %v2061_v55 }
  0xf8   : > { %v2109_v0 = vpop.permute.xlu2 %598 }
  0xf9   : > { %v391_v1 = vpop.permute.xlu0 %390 }
  0xfe   : > { %778 = vrot.lane.b32.xlu1 %v1969_v31, %s1828_s7  ;;  %786 = vrot.lane.b32.xlu2 %v1967_v30, %s1828_s7 }
  0xff   : > { %782 = vrot.lane.b32.xlu0 %v1988_v35, %s1828_s7 }
 0x100   : > { %v407_v2 = vpop.permute.xlu1 %406  ;;  %v2117_v4 = vpop.permute.xlu2 %582 }
 0x101   : > { %526 = vmatpush.bf16.msra.mxu3 %v407_v2  ;;  %v405_v5 = vpop.permute.xlu0 %404 }
 0x102   : > { %v431_v19 = vsel %vm416_vm2, %v405_v5, %v407_v2 }
 0x105   : > { %527 = vmatpush.bf16.msra.mxu3 %v399_v62 }
 0x106   : > { %768 = vrot.lane.b32.xlu1 %v2004_v40, %s1828_s7  ;;  %780 = vrot.lane.b32.xlu2 %v2011_v43, %s1828_s7 }
 0x107   : > { %772 = vrot.lane.b32.xlu0 %v1995_v38, %s1828_s7  ;;  %v421_v38 = vsel %vm416_vm2, %v2105_v63, %v2046_v50 }
 0x108   : > { %v2125_v6 = vpop.permute.xlu1 %590  ;;  %v409_v9 = vpop.permute.xlu2 %408 }
 0x109   : > { %528 = vmatpush.bf16.msra.mxu3 %v391_v1  ;;  %v411_v10 = vpop.permute.xlu0 %410 }
 0x10a   : > { %v432_v11 = vsel %vm416_vm2, %v409_v9, %v411_v10 }
 0x10b   : > { %468 = vmatpush.bf16.msra.mxu0 %v432_v11 }
 0x10d   : > { %529 = vmatpush.bf16.msra.mxu3 %v2057_v53 }
 0x10e   : > { %774 = vrot.lane.b32.xlu1 %v2014_v44, %s1828_s7  ;;  %770 = vrot.lane.b32.xlu2 %v1981_v34, %s1828_s7 }
 0x10f   : > { %762 = vrot.lane.b32.xlu0 %v1963_v29, %s1828_s7 }
 0x110   : > { %v413_v12 = vpop.permute.xlu1 %412  ;;  %v389_v13 = vpop.permute.xlu2 %388 }
 0x111   : > { %530 = vmatpush.bf16.msra.mxu3 %v2061_v55  ;;  %v433_v14 = vsel %vm416_vm2, %v411_v10, %v413_v12  ;;  %v434_v18 = vsel %vm416_vm2, %v413_v12, %v415_v61  ;;  %v401_v24 = vpop.permute.xlu0 %400  ;;  %v425_v26 = vsel %vm416_vm2, %v389_v13, %v391_v1  ;;  %v1777_v1 = vld [vmem:[%s2719_s2] sm:$0xff] }
 0x112   : > { %487 = vmatpush.bf16.msra.mxu1 %v433_v14  ;;  %506 = vmatpush.bf16.msra.mxu2 %v434_v18 }
 0x115   : > { %708 = vmatpush.bf16.msrb.mxu3 %v2109_v0 }
 0x116   : > { %764 = vrot.lane.b32.xlu1 %v2030_v48, %s1828_s7  ;;  %760 = vrot.lane.b32.xlu2 %v2027_v47, %s1828_s7  ;;  %v1780_v48 = vld [vmem:[%s2719_s2 + $0x18] sm:$0xff] }
 0x117   : > { %507 = vmatpush.bf16.msra.mxu2 %v431_v19  ;;  %752 = vrot.lane.b32.xlu0 %v1886_v3, %s1828_s7  ;;  %v1778_v19 = vld [vmem:[%s2719_s2 + $0x8] sm:$0xff] }
 0x118   : > { %v397_v21 = vpop.permute.xlu1 %396  ;;  %v395_v22 = vpop.permute.xlu2 %394 }
 0x119   : > { %709 = vmatpush.bf16.msrb.mxu3 %v2125_v6  ;;  %v428_v25 = vsel %vm416_vm2, %v397_v21, %v399_v62  ;;  %v427_v31 = vsel %vm416_vm2, %v395_v22, %v397_v21 }
 0x11b   : > { %508 = vmatpush.bf16.msra.mxu2 %v428_v25 }
 0x11d   : > { %710 = vmatpush.bf16.msrb.mxu3 %v2117_v4 }
 0x11e   : > { %754 = vrot.lane.b32.xlu1 %v1907_v15, %s1828_s7  ;;  %766 = vrot.lane.b32.xlu2 %v2039_v49, %s1828_s7  ;;  %v422_v15 = vsel %vm416_vm2, %v2046_v50, %v2057_v53 }
 0x11f   : > { %509 = vmatpush.bf16.msra.mxu2 %v425_v26  ;;  %758 = vrot.lane.b32.xlu0 %v2017_v45, %s1828_s7 }
 0x120   : > { %v403_v3 = vpop.permute.xlu1 %402  ;;  %v385_v27 = vpop.permute.xlu2 %384 }
 0x121   : > { %v387_v28 = vpop.permute.xlu0 %386  ;;  %v429_v29 = vsel %vm416_vm2, %v401_v24, %v403_v3  ;;  %v430_v30 = vsel %vm416_vm2, %v403_v3, %v405_v5 }
 0x122   : > { %469 = vmatpush.bf16.msra.mxu0 %v429_v29  ;;  %488 = vmatpush.bf16.msra.mxu1 %v430_v30  ;;  %v424_v37 = vsel %vm416_vm2, %v387_v28, %v389_v13 }
 0x123   : > { %510 = vmatpush.bf16.msra.mxu2 %v422_v15 }
 0x126   : > { %744 = vrot.lane.b32.xlu1 %v1891_v7, %s1828_s7  ;;  %756 = vrot.lane.b32.xlu2 %v2049_v52, %s1828_s7  ;;  %v1779_v7 = vld [vmem:[%s2719_s2 + $0x10] sm:$0xff] }
 0x127   : > { %489 = vmatpush.bf16.msra.mxu1 %v427_v31  ;;  %511 = vmatpush.bf16.msra.mxu2 %v419_v32 }
 0x128   : > { %748 = vrot.lane.b32.xlu0 %v1893_v8, %s1828_s7  ;;  %v393_v33 = vpop.permute.xlu1 %392  ;;  %v593_v34 = vpop.permute.xlu2 %592  ;;  %1679 = vmatmul.msk.bf16.vlgmr.msra.gmra.mxu3 %vm459_vm3, %v1779_v7  ;;  %v423_v8 = vsel %vm416_vm2, %v385_v27, %v387_v28 }
 0x129   : > { %v589_v35 = vpop.permute.xlu0 %588  ;;  %v426_v36 = vsel %vm416_vm2, %v393_v33, %v395_v22 }
 0x12a   : > { %470 = vmatpush.bf16.msra.mxu0 %v426_v36  ;;  %1677 = vmatmul.msk.bf16.vlgmr.msra.gmra.mxu2 %vm459_vm3, %v1779_v7 }
 0x12b   : > { %490 = vmatpush.bf16.msra.mxu1 %v424_v37 }
 0x12e   : > { %750 = vrot.lane.b32.xlu1 %v1911_v17, %s1828_s7  ;;  %471 = vmatpush.bf16.msra.mxu0 %v423_v8  ;;  %v420_v17 = vsel %vm416_vm2, %v2059_v54, %v2105_v63 }
 0x12f   : > { %491 = vmatpush.bf16.msra.mxu1 %v421_v38  ;;  %746 = vrot.lane.b32.xlu2 %v1909_v16, %s1828_s7  ;;  %v615_v16 = vsel %vm600_vm4, %v589_v35, %v2125_v6 }
 0x130   : > { %742 = vrot.lane.b32.xlu0 %v1931_v23, %s1828_s7  ;;  %v597_v39 = vpop.permute.xlu1 %596  ;;  %v573_v40 = vpop.permute.xlu2 %572 }
 0x131   : > { %v595_v41 = vpop.permute.xlu0 %594  ;;  %v618_v42 = vsel %vm600_vm4, %v597_v39, %v2109_v0 }
 0x132   : > { %472 = vmatpush.bf16.msra.mxu0 %v420_v17  ;;  %689 = vmatpush.bf16.msrb.mxu2 %v618_v42  ;;  %v617_v43 = vsel %vm600_vm4, %v595_v41, %v597_v39  ;;  %v616_v23 = vsel %vm600_vm4, %v593_v34, %v595_v41  ;;  %v255_v41 = vld [vmem:[%s2720_s3] sm:$0xff] }
 0x133   : > { %492 = vmatpush.bf16.msra.mxu1 %v2073_v58 }
 0x136   : > { %473 = vmatpush.bf16.msra.mxu0 %v2080_v60  ;;  %690 = vmatpush.bf16.msrb.mxu2 %v615_v16 }
 0x137   : > { %670 = vmatpush.bf16.msrb.mxu1 %v617_v43  ;;  %740 = vrot.lane.b32.xlu2 %v1921_v20, %s1828_s7  ;;  %v1829_v43 = vmov 0  }
 0x138   : > { %1675 = vmatmul.msk.bf16.vlgmr.msra.gmra.mxu1 %vm459_vm3, %v1779_v7  ;;  %v581_v44 = vpop.permute.xlu1 %580  ;;  %v579_v45 = vpop.permute.xlu2 %578  ;;  %1680 = vmatmul.msk.bf16.gmra.mxu3 %vm459_vm3, %v1780_v48 }
 0x139   : > { %v585_v46 = vpop.permute.xlu0 %584  ;;  %v612_v47 = vsel %vm600_vm4, %v581_v44, %v2117_v4  ;;  %1673 = vmatmul.msk.bf16.vlgmr.msra.gmra.mxu0 %vm459_vm3, %v1779_v7  ;;  %v611_v54 = vsel %vm600_vm4, %v579_v45, %v581_v44  ;;  %1815 = vset.pattern.permute.xlu0 %v1829_v43 }
 0x13a   : > { %651 = vmatpush.bf16.msrb.mxu0 %v616_v23  ;;  %691 = vmatpush.bf16.msrb.mxu2 %v612_v47 }
 0x13b   : > { %1678 = vmatmul.msk.bf16.gmra.mxu2 %vm459_vm3, %v1780_v48  ;;  %1813 = vset.pattern.permute.xlu1 %v1829_v43 }
 0x13c   : > { %931 = vperm.xlu0 %1815, %v255_v41   ;;  %1814 = vset.pattern.permute.xlu2 %v1829_v43 }
 0x140   : > { %v587_v49 = vpop.permute.xlu1 %586  ;;  %v569_v50 = vpop.permute.xlu2 %568 }
 0x141   : > { %v575_v51 = vpop.permute.xlu0 %574  ;;  %v613_v20 = vsel %vm600_vm4, %v585_v46, %v587_v49  ;;  %v614_v52 = vsel %vm600_vm4, %v587_v49, %v589_v35  ;;  %v256_v46 = vld [vmem:[%s2720_s3 + $0x8] sm:$0xff]  ;;  %v1781_v49 = vld [vmem:[%s2719_s2 + $0x20] sm:$0xff] }
 0x142   : > { %652 = vmatpush.bf16.msrb.mxu0 %v613_v20  ;;  %671 = vmatpush.bf16.msrb.mxu1 %v614_v52  ;;  %v609_v53 = vsel %vm600_vm4, %v573_v40, %v575_v51 }
 0x143   : > { %711 = vmatpush.bf16.msrb.mxu3 %v575_v51  ;;  %692 = vmatpush.bf16.msrb.mxu2 %v609_v53 }
 0x146   : > { %672 = vmatpush.bf16.msrb.mxu1 %v611_v54 }
 0x148   : > { %1676 = vmatmul.msk.bf16.gmra.mxu1 %vm459_vm3, %v1780_v48  ;;  %v577_v55 = vpop.permute.xlu1 %576  ;;  %v559_v56 = vpop.permute.xlu2 %558 }
 0x149   : > { %v565_v57 = vpop.permute.xlu0 %564  ;;  %v610_v58 = vsel %vm600_vm4, %v577_v55, %v579_v45  ;;  %1674 = vmatmul.msk.bf16.gmra.mxu0 %vm459_vm3, %v1780_v48 }
 0x14a   : > { %653 = vmatpush.bf16.msrb.mxu0 %v610_v58  ;;  %v1782_v58 = vld [vmem:[%s2719_s2 + $0x28] sm:$0xff] }
 0x150   : > { %v567_v59 = vpop.permute.xlu1 %566  ;;  %v553_v60 = vpop.permute.xlu2 %552 }
 0x151   : > { %712 = vmatpush.bf16.msrb.mxu3 %v567_v59  ;;  %v571_v61 = vpop.permute.xlu0 %570  ;;  %v606_v62 = vsel %vm600_vm4, %v565_v57, %v567_v59 }
 0x152   : > { %693 = vmatpush.bf16.msrb.mxu2 %v606_v62  ;;  %v607_v63 = vsel %vm600_vm4, %v569_v50, %v571_v61  ;;  %v608_v0 = vsel %vm600_vm4, %v571_v61, %v573_v40  ;;  %v257_v40 = vld [vmem:[%s2720_s3 + $0x10] sm:$0xff] }
 0x153   : > { %654 = vmatpush.bf16.msrb.mxu0 %v607_v63  ;;  %673 = vmatpush.bf16.msrb.mxu1 %v608_v0 }
 0x154   : > { %941 = vperm.xlu1 %1813, %v257_v40  }
 0x155   : > { %713 = vmatpush.bf16.msrb.mxu3 %v559_v56 }
 0x158   : > { %v557_v2 = vpop.permute.xlu1 %556  ;;  %v787_v4 = vpop.permute.xlu2 %786  ;;  %1695 = vmatmul.msk.bf16.vlgmr.msrb.gmra.mxu3 %vm459_vm3, %v1777_v1 }
 0x159   : > { %896 = vmatpush.bf16.msra.mxu3 %v787_v4  ;;  %v561_v5 = vpop.permute.xlu0 %560  ;;  %v603_v6 = vsel %vm600_vm4, %v557_v2, %v559_v56 }
 0x15a   : > { %694 = vmatpush.bf16.msrb.mxu2 %v603_v6 }
 0x15c   : > { %936 = vperm.xlu1 %1813, %v256_v46  }
 0x15d   : > { %1693 = vmatmul.msk.bf16.vlgmr.msrb.gmra.mxu2 %vm459_vm3, %v1777_v1 }
 0x160   : > { %v563_v9 = vpop.permute.xlu1 %562  ;;  %v781_v13 = vpop.permute.xlu2 %780 }
 0x161   : > { %v555_v10 = vpop.permute.xlu0 %554  ;;  %v604_v11 = vsel %vm600_vm4, %v561_v5, %v563_v9  ;;  %v605_v12 = vsel %vm600_vm4, %v563_v9, %v565_v57 }
 0x162   : > { %655 = vmatpush.bf16.msrb.mxu0 %v604_v11  ;;  %674 = vmatpush.bf16.msrb.mxu1 %v605_v12  ;;  %v601_v14 = vsel %vm600_vm4, %v553_v60, %v555_v10  ;;  %v602_v18 = vsel %vm600_vm4, %v555_v10, %v557_v2  ;;  %v258_v60 = vld [vmem:[%s2720_s3 + $0x18] sm:$0xff] }
 0x163   : > { %946 = vperm.xlu2 %1814, %v258_v60  }
 0x166   : > { %656 = vmatpush.bf16.msrb.mxu0 %v601_v14  ;;  %675 = vmatpush.bf16.msrb.mxu1 %v602_v18 }
 0x168   : > { %v785_v21 = vpop.permute.xlu1 %784  ;;  %1696 = vmatmul.msk.bf16.gmra.mxu3 %vm459_vm3, %v1778_v19  ;;  %v771_v25 = vpop.permute.xlu2 %770 }
 0x169   : > { %v806_v22 = vsel %vm788_vm5, %v785_v21, %v787_v4  ;;  %1689 = vmatmul.msk.bf16.vlgmr.msrb.gmra.mxu0 %vm459_vm3, %v1777_v1  ;;  %1691 = vmatmul.msk.bf16.vlgmr.msrb.gmra.mxu1 %vm459_vm3, %v1777_v1  ;;  %v777_v24 = vpop.permute.xlu0 %776 }
 0x16a   : > { %877 = vmatpush.bf16.msra.mxu2 %v806_v22 }
 0x16d   : > { %1694 = vmatmul.msk.bf16.gmra.mxu2 %vm459_vm3, %v1778_v19 }
 0x170   : > { %v779_v26 = vpop.permute.xlu1 %778  ;;  %v761_v30 = vpop.permute.xlu2 %760 }
 0x171   : > { %897 = vmatpush.bf16.msra.mxu3 %v779_v26  ;;  %v783_v3 = vpop.permute.xlu0 %782  ;;  %v803_v27 = vsel %vm788_vm5, %v777_v24, %v779_v26 }
 0x172   : > { %v804_v28 = vsel %vm788_vm5, %v781_v13, %v783_v3  ;;  %v805_v29 = vsel %vm788_vm5, %v783_v3, %v785_v21  ;;  %878 = vmatpush.bf16.msra.mxu2 %v803_v27 }
 0x173   : > { %839 = vmatpush.bf16.msra.mxu0 %v804_v28  ;;  %858 = vmatpush.bf16.msra.mxu1 %v805_v29 }
 0x175   : > { %898 = vmatpush.bf16.msra.mxu3 %v771_v25 }
 0x178   : > { %v769_v15 = vpop.permute.xlu1 %768  ;;  %v767_v33 = vpop.permute.xlu2 %766 }
 0x179   : > { %1690 = vmatmul.msk.bf16.gmra.mxu0 %vm459_vm3, %v1778_v19  ;;  %1692 = vmatmul.msk.bf16.gmra.mxu1 %vm459_vm3, %v1778_v19  ;;  %v773_v31 = vpop.permute.xlu0 %772  ;;  %v800_v32 = vsel %vm788_vm5, %v769_v15, %v771_v25  ;;  %v799_v8 = vsel %vm788_vm5, %v767_v33, %v769_v15 }
 0x17a   : > { %879 = vmatpush.bf16.msra.mxu2 %v800_v32 }
 0x180   : > { %v775_v34 = vpop.permute.xlu1 %774  ;;  %v757_v17 = vpop.permute.xlu2 %756 }
 0x181   : > { %v763_v7 = vpop.permute.xlu0 %762  ;;  %v801_v35 = vsel %vm788_vm5, %v773_v31, %v775_v34  ;;  %v802_v36 = vsel %vm788_vm5, %v775_v34, %v777_v24 }
 0x182   : > { %840 = vmatpush.bf16.msra.mxu0 %v801_v35  ;;  %859 = vmatpush.bf16.msra.mxu1 %v802_v36  ;;  %v797_v37 = vsel %vm788_vm5, %v761_v30, %v763_v7 }
 0x183   : > { %899 = vmatpush.bf16.msra.mxu3 %v763_v7  ;;  %880 = vmatpush.bf16.msra.mxu2 %v797_v37 }
 0x186   : > { %860 = vmatpush.bf16.msra.mxu1 %v799_v8 }
 0x188   : > { %v765_v38 = vpop.permute.xlu1 %764 }
 0x189   : > { %v798_v39 = vsel %vm788_vm5, %v765_v38, %v767_v33  ;;  %v753_v42 = vpop.permute.xlu0 %752  ;;  %v747_v45 = vpop.permute.xlu2 %746 }
 0x18a   : > { %841 = vmatpush.bf16.msra.mxu0 %v798_v39 }
 0x190   : > { %v755_v16 = vpop.permute.xlu1 %754 }
 0x191   : > { %900 = vmatpush.bf16.msra.mxu3 %v755_v16  ;;  %v794_v23 = vsel %vm788_vm5, %v753_v42, %v755_v16  ;;  %v759_v44 = vpop.permute.xlu0 %758  ;;  %v741_v53 = vpop.permute.xlu2 %740 }
 0x192   : > { %881 = vmatpush.bf16.msra.mxu2 %v794_v23  ;;  %v795_v47 = vsel %vm788_vm5, %v757_v17, %v759_v44  ;;  %v796_v48 = vsel %vm788_vm5, %v759_v44, %v761_v30  ;;  %v253_v30 = vld [vmem:[%s2718_s1] sm:$0xf] }
 0x193   : > { %842 = vmatpush.bf16.msra.mxu0 %v795_v47  ;;  %861 = vmatpush.bf16.msra.mxu1 %v796_v48  ;;  %vm254_vm6 = vcmp.gt.f32.partialorder %v253_v30, 0.0 }
 0x194   : > { %v981_v33 = vsel %vm254_vm6, 1, %v1829_v43 }
 0x195   : > { %901 = vmatpush.bf16.msra.mxu3 %v747_v45  ;;  %v985_v8 = vperm.slane %v981_v33, 3  ;;  %v984_v23 = vperm.slane %v981_v33, 2 }
 0x197   : > { %vm2324_vm7 = vcmp.eq.s32.totalorder %v985_v8, 1  ;;  %vm2330_vm8 = vcmp.eq.s32.totalorder %v984_v23, 1 }
 0x198   : > { %v745_v50 = vpop.permute.xlu1 %744  ;;  %1715 = vmatmul.msk.bf16.vlgmr.msra.gmra.mxu3 %vm459_vm3, %v1781_v49 }
 0x199   : > { %v791_v51 = vsel %vm788_vm5, %v745_v50, %v747_v45 }
 0x19a   : > { %v749_v20 = vpop.permute.xlu0 %748  ;;  %882 = vmatpush.bf16.msra.mxu2 %v791_v51 }
 0x19d   : > { %1713 = vmatmul.msk.bf16.vlgmr.msra.gmra.mxu2 %vm459_vm3, %v1781_v49 }
 0x1a0   : > { %v751_v52 = vpop.permute.xlu1 %750 }
 0x1a1   : > { %v792_v54 = vsel %vm788_vm5, %v749_v20, %v751_v52  ;;  %v793_v55 = vsel %vm788_vm5, %v751_v52, %v753_v42 }
 0x1a2   : > { %v743_v56 = vpop.permute.xlu0 %742  ;;  %843 = vmatpush.bf16.msra.mxu0 %v792_v54  ;;  %862 = vmatpush.bf16.msra.mxu1 %v793_v55 }
 0x1a3   : > { %v789_v57 = vsel %vm788_vm5, %v741_v53, %v743_v56  ;;  %v790_v59 = vsel %vm788_vm5, %v743_v56, %v745_v50  ;;  %v982_v56 = vperm.slane %v981_v33, 0 }
 0x1a5   : > { %vm2337_vm9 = vcmp.eq.s32.totalorder %v982_v56, 1 }
 0x1a6   : > { %844 = vmatpush.bf16.msra.mxu0 %v789_v57  ;;  %863 = vmatpush.bf16.msra.mxu1 %v790_v59 }
 0x1a8   : > { %1716 = vmatmul.msk.bf16.gmra.mxu3 %vm459_vm3, %v1782_v58 }
 0x1a9   : > { %1709 = vmatmul.msk.bf16.vlgmr.msra.gmra.mxu0 %vm459_vm3, %v1781_v49  ;;  %1711 = vmatmul.msk.bf16.vlgmr.msra.gmra.mxu1 %vm459_vm3, %v1781_v49 }
 0x1ab   : > { %v532_v61 = vpop.f32.mrf.mxu3 }
 0x1ad   : > { %1714 = vmatmul.msk.bf16.gmra.mxu2 %vm459_vm3, %v1782_v58  ;;  %v513_v62 = vpop.f32.mrf.mxu2 }
 0x1ae   : > { %v932_v37 = vpop.permute.xlu0 %931 }
 0x1b3   : > { %v534_v63 = vpop.f32.mrf.mxu3 }
 0x1b5   : > { %v494_v1 = vpop.f32.mrf.mxu1  ;;  %v515_v2 = vpop.f32.mrf.mxu2 }
 0x1b6   : > { %v475_v0 = vpop.f32.mrf.mxu0 }
 0x1b9   : > { %1710 = vmatmul.msk.bf16.gmra.mxu0 %vm459_vm3, %v1782_v58  ;;  %1712 = vmatmul.msk.bf16.gmra.mxu1 %vm459_vm3, %v1782_v58  ;;  %v983_v58 = vperm.slane %v981_v33, 1 }
 0x1bb   : > { %v2286_v4 = vpop.f32.mrf.mxu3  ;;  %vm2341_vm10 = vcmp.eq.s32.totalorder %v983_v58, 1 }
 0x1bd   : > { %v2290_v6 = vpop.f32.mrf.mxu1 }
 0x1be   : > { %v2288_v5 = vpop.f32.mrf.mxu0  ;;  %v2292_v9 = vpop.f32.mrf.mxu2 }
 0x1c3   : > { %v2294_v10 = vpop.f32.mrf.mxu3 }
 0x1c5   : > { %v2298_v12 = vpop.f32.mrf.mxu1 }
 0x1c6   : > { %v2296_v11 = vpop.f32.mrf.mxu0  ;;  %v2300_v13 = vpop.f32.mrf.mxu2 }
 0x1c7   : > { %v2318_v35 = vpop.permute.xlu1 %941 }
 0x1cd   : > { %v2304_v19 = vpop.f32.mrf.mxu1 }
 0x1ce   : > { %v2302_v18 = vpop.f32.mrf.mxu0 }
 0x1cf   : > { %v937_v51 = vpop.permute.xlu1 %936 }
 0x1db   : > { %v715_v14 = vpop.f32.mrf.mxu3 }
 0x1dc   : > { %v716_v7 = vadd.f32 %v715_v14, %v532_v61 }
 0x1e0   : > { %v696_v21 = vpop.f32.mrf.mxu2 }
 0x1e1   : > { %v697_v17 = vadd.f32 %v696_v21, %v513_v62 }
 0x1e3   : > { %v717_v22 = vpop.f32.mrf.mxu3 }
 0x1e4   : > { %v718_v45 = vadd.f32 %v717_v22, %v534_v63 }
 0x1e6   : > { %v658_v24 = vpop.f32.mrf.mxu0  ;;  %v677_v25 = vpop.f32.mrf.mxu1 }
 0x1e7   : > { %v659_v20 = vadd.f32 %v658_v24, %v475_v0  ;;  %v678_v52 = vadd.f32 %v677_v25, %v494_v1 }
 0x1e8   : > { %v698_v26 = vpop.f32.mrf.mxu2 }
 0x1e9   : > { %v699_v54 = vadd.f32 %v698_v26, %v515_v2 }
 0x1eb   : > { %v720_v3 = vpop.f32.mrf.mxu3 }
 0x1ec   : > { %v721_v0 = vadd.f32 %v720_v3, %v2286_v4 }
 0x1ee   : > { %v660_v27 = vpop.f32.mrf.mxu0  ;;  %v679_v28 = vpop.f32.mrf.mxu1 }
 0x1f0   : > { %v701_v29 = vpop.f32.mrf.mxu2 }
 0x1f3   : > { %v2309_v15 = vpop.f32.mrf.mxu3 }
 0x1f6   : > { %v2311_v31 = vpop.f32.mrf.mxu0  ;;  %v2313_v32 = vpop.f32.mrf.mxu1 }
 0x1f8   : > { %v2316_v34 = vpop.f32.mrf.mxu2 }
 0x1fe   : > { %v2320_v39 = vpop.f32.mrf.mxu0  ;;  %v2322_v40 = vpop.f32.mrf.mxu1 }
 0x21b   : > { %v903_v36 = vpop.f32.mrf.mxu3 }
 0x21c   : > { %v916_v38 = vadd.f32 %v903_v36, %v716_v7  ;;  %v661_v36 = vadd.f32 %v660_v27, %v2288_v5 }
 0x21e   : > { %v952_v41 = vadd.f32 %v932_v37, %v916_v38 }
 0x220   : > { %v968_v43 = vmax.f32 %v952_v41, 0.0  ;;  %v884_v16 = vpop.f32.mrf.mxu2  ;;  %v702_v41 = vadd.f32 %v701_v29, %v2292_v9 }
 0x221   : > { %v915_v44 = vadd.f32 %v884_v16, %v697_v17 }
 0x222   : > { %v993_v46 = vsel %vm2324_vm7, %v968_v43, 0.0 }
 0x223   : > { %v951_v47 = vadd.f32 %v932_v37, %v915_v44  ;;  %v905_v48 = vpop.f32.mrf.mxu3  ;;  %v723_v44 = vadd.f32 %v2309_v15, %v2294_v10  ;;  %v664_v10 = vadd.f32 %v2311_v31, %v2296_v11 }
 0x224   : > { %v920_v50 = vadd.f32 %v905_v48, %v718_v45 }
 0x225   : > { %v967_v53 = vmax.f32 %v951_v47, 0.0 }
 0x226   : > { %v846_v55 = vpop.f32.mrf.mxu0  ;;  %v865_v57 = vpop.f32.mrf.mxu1  ;;  %v956_v60 = vadd.f32 %v937_v51, %v920_v50 }
 0x227   : > { %v992_v59 = vsel %vm2330_vm8, %v967_v53, 0.0  ;;  %v913_v61 = vadd.f32 %v846_v55, %v659_v20  ;;  %v914_v62 = vadd.f32 %v865_v57, %v678_v52 }
 0x228   : > { %v1007_v63 = vpack.c.bf16 %v993_v46, %v992_v59  ;;  %v886_v14 = vpop.f32.mrf.mxu2  ;;  %v972_v24 = vmax.f32 %v956_v60, 0.0  ;;  %v947_v59 = vpop.permute.xlu2 %946 }
 0x229   : > { %v949_v21 = vadd.f32 %v932_v37, %v913_v61  ;;  %v950_v22 = vadd.f32 %v932_v37, %v914_v62  ;;  %v919_v30 = vadd.f32 %v886_v14, %v699_v54  ;;  %v680_v37 = vadd.f32 %v679_v28, %v2290_v6 }
 0x22a   : > { %v997_v6 = vsel %vm2324_vm7, %v972_v24, 0.0  ;;  %v1024_v9 = vunpack.c.l.b16 %v1007_v63  ;;  %v1046_v20 = vunpack.c.h.b16 %v1007_v63  ;;  %v683_v61 = vadd.f32 %v2313_v32, %v2298_v12 }
 0x22b   : > { %v965_v25 = vmax.f32 %v949_v21, 0.0  ;;  %v966_v26 = vmax.f32 %v950_v22, 0.0  ;;  %v955_v33 = vadd.f32 %v937_v51, %v919_v30  ;;  %v908_v7 = vpop.f32.mrf.mxu3  ;;  %v704_v21 = vadd.f32 %v2316_v34, %v2300_v13 }
 0x22c   : > { %v924_v8 = vadd.f32 %v908_v7, %v721_v0 }
 0x22d   : > { %v990_v4 = vsel %vm2337_vm9, %v965_v25, 0.0  ;;  %v991_v3 = vsel %vm2341_vm10, %v966_v26, 0.0  ;;  %v971_v38 = vmax.f32 %v955_v33, 0.0 }
 0x22e   : > { %v1006_v17 = vpack.c.bf16 %v991_v3, %v990_v4  ;;  %v960_v43 = vadd.f32 %v2318_v35, %v924_v8  ;;  %v848_v16 = vpop.f32.mrf.mxu0  ;;  %v867_v23 = vpop.f32.mrf.mxu1 }
 0x22f   : > { %v996_v5 = vsel %vm2330_vm8, %v971_v38, 0.0  ;;  %v917_v27 = vadd.f32 %v848_v16, %v661_v36  ;;  %v918_v28 = vadd.f32 %v867_v23, %v680_v37  ;;  %v666_v16 = vadd.f32 %v2320_v39, %v2302_v18 }
 0x230   : > { %v1009_v45 = vpack.c.bf16 %v997_v6, %v996_v5  ;;  %v976_v46 = vmax.f32 %v960_v43, 0.0  ;;  %v889_v47 = vpop.f32.mrf.mxu2  ;;  %v1022_v22 = vunpack.c.l.b16 %v1006_v17  ;;  %v1023_v24 = vunpack.c.h.b16 %v1006_v17 }
 0x231   : > { %v953_v29 = vadd.f32 %v937_v51, %v917_v27  ;;  %v954_v48 = vadd.f32 %v937_v51, %v918_v28  ;;  %v923_v50 = vadd.f32 %v889_v47, %v702_v41 }
 0x232   : > { %v1027_v52 = vunpack.c.l.b16 %v1009_v45  ;;  %v1047_v53 = vunpack.c.h.b16 %v1009_v45  ;;  %v1001_v54 = vsel %vm2324_vm7, %v976_v46, 0.0 }
 0x233   : > { %v969_v55 = vmax.f32 %v953_v29, 0.0  ;;  %v970_v56 = vmax.f32 %v954_v48, 0.0  ;;  %v959_v57 = vadd.f32 %v2318_v35, %v923_v50  ;;  %v910_v58 = vpop.f32.mrf.mxu3 }
 0x234   : > { %v2364_v15 = vpack.c.b16 %v1027_v52, %v1024_v9  ;;  %v928_v60 = vadd.f32 %v910_v58, %v723_v44  ;;  %v2366_v51 = vpack.c.b16 %v1047_v53, %v1046_v20 }
 0x235   : > { %v994_v62 = vsel %vm2337_vm9, %v969_v55, 0.0  ;;  %v995_v63 = vsel %vm2341_vm10, %v970_v56, 0.0  ;;  %v975_v14 = vmax.f32 %v959_v57, 0.0 }
 0x236   : > { %v1008_v11 = vpack.c.bf16 %v995_v63, %v994_v62  ;;  %v964_v31 = vadd.f32 %v947_v59, %v928_v60  ;;  %v851_v30 = vpop.f32.mrf.mxu0  ;;  %v870_v0 = vpop.f32.mrf.mxu1 }
 0x237   : > { %v1000_v25 = vsel %vm2330_vm8, %v975_v14, 0.0  ;;  %v921_v12 = vadd.f32 %v851_v30, %v664_v10  ;;  %v922_v32 = vadd.f32 %v870_v0, %v683_v61 }
 0x238   : > { %v1025_v26 = vunpack.c.l.b16 %v1008_v11  ;;  %v1026_v33 = vunpack.c.h.b16 %v1008_v11  ;;  %v1011_v7 = vpack.c.bf16 %v1001_v54, %v1000_v25  ;;  %v980_v36 = vmax.f32 %v964_v31, 0.0  ;;  %v891_v8 = vpop.f32.mrf.mxu2 }
 0x239   : > { %v957_v37 = vadd.f32 %v2318_v35, %v921_v12  ;;  %v958_v13 = vadd.f32 %v2318_v35, %v922_v32  ;;  %v927_v34 = vadd.f32 %v891_v8, %v704_v21  ;;  %v685_v35 = vadd.f32 %v2322_v40, %v2304_v19 }
 0x23a   : > { %v2380_v4 = vpack.c.b16 %v1025_v26, %v1022_v22  ;;  %v2382_v3 = vpack.c.b16 %v1026_v33, %v1023_v24  ;;  %v1005_v43 = vsel %vm2324_vm7, %v980_v36, 0.0  ;;  %v1030_v46 = vunpack.c.l.b16 %v1011_v7 }
 0x23b   : > { %v973_v38 = vmax.f32 %v957_v37, 0.0  ;;  %v974_v41 = vmax.f32 %v958_v13, 0.0  ;;  %v963_v17 = vadd.f32 %v947_v59, %v927_v34  ;;  %v1048_v47 = vunpack.c.h.b16 %v1011_v7 }
 0x23c   : > { %1082 = vrot.lane.b32.xlu2 %v2382_v3, %s1824_s27  ;;  %1052 = vrot.lane.b32.xlu0 %v2380_v4, %s1825_s28 }
 0x23d   : > { %v998_v23 = vsel %vm2337_vm9, %v973_v38, 0.0  ;;  %v999_v5 = vsel %vm2341_vm10, %v974_v41, 0.0  ;;  %v979_v42 = vmax.f32 %v963_v17, 0.0  ;;  %1080 = vrot.lane.b32.xlu1 %v2380_v4, %s1824_s27 }
 0x23e   : > { %v1010_v18 = vpack.c.bf16 %v999_v5, %v998_v23  ;;  %v853_v39 = vpop.f32.mrf.mxu0  ;;  %v872_v6 = vpop.f32.mrf.mxu1 }
 0x23f   : > { %v1004_v27 = vsel %vm2330_vm8, %v979_v42, 0.0  ;;  %v925_v28 = vadd.f32 %v853_v39, %v666_v16  ;;  %v926_v44 = vadd.f32 %v872_v6, %v685_v35 }
 0x240   : > { %v1013_v45 = vpack.c.bf16 %v1005_v43, %v1004_v27  ;;  %v1028_v55 = vunpack.c.l.b16 %v1010_v18  ;;  %v1029_v56 = vunpack.c.h.b16 %v1010_v18  ;;  %v259_v27 = vld [vmem:[%s2722_s5] sm:$0xff] }
 0x241   : > { %v961_v19 = vadd.f32 %v947_v59, %v925_v28  ;;  %v962_v40 = vadd.f32 %v947_v59, %v926_v44 }
 0x242   : > { %v1033_v9 = vunpack.c.l.b16 %v1013_v45  ;;  %v1049_v29 = vunpack.c.h.b16 %v1013_v45  ;;  %v262_v45 = vld [vmem:[%s2722_s5 + $0x18] sm:$0xff] }
 0x243   : > { %v977_v48 = vmax.f32 %v961_v19, 0.0  ;;  %v978_v50 = vmax.f32 %v962_v40, 0.0  ;;  %v260_v19 = vld [vmem:[%s2722_s5 + $0x8] sm:$0xff] }
 0x244   : > { %v2402_v20 = vpack.c.b16 %v1033_v9, %v1030_v46  ;;  %1129 = vrot.lane.b32.xlu2 %v2382_v3, %s1830_s10  ;;  %1084 = vrot.lane.b32.xlu0 %v2364_v15, %s1824_s27  ;;  %v2408_v49 = vpack.c.b16 %v1049_v29, %v1048_v47  ;;  %v261_v9 = vld [vmem:[%s2722_s5 + $0x10] sm:$0xff] }
 0x245   : > { %v1002_v52 = vsel %vm2337_vm9, %v977_v48, 0.0  ;;  %v1003_v53 = vsel %vm2341_vm10, %v978_v50, 0.0  ;;  %1054 = vrot.lane.b32.xlu1 %v2382_v3, %s1825_s28 }
 0x246   : > { %v1012_v54 = vpack.c.bf16 %v1003_v53, %v1002_v52 }
 0x248   : > { %v1031_v57 = vunpack.c.l.b16 %v1012_v54  ;;  %v1032_v58 = vunpack.c.h.b16 %v1012_v54 }
 0x24a   : > { %v2416_v59 = vpack.c.b16 %v1031_v57, %v1028_v55  ;;  %v2418_v10 = vpack.c.b16 %v1032_v58, %v1029_v56 }
 0x24c   : > { %1056 = vrot.lane.b32.xlu2 %v2364_v15, %s1825_s28  ;;  %1058 = vrot.lane.b32.xlu0 %v2366_v51, %s1825_s28 }
 0x24d   : > { %1127 = vrot.lane.b32.xlu1 %v2380_v4, %s1830_s10 }
 0x254   : > { %1088 = vrot.lane.b32.xlu2 %v2416_v59, %s1824_s27  ;;  %1062 = vrot.lane.b32.xlu0 %v2418_v10, %s1825_s28 }
 0x255   : > { %1086 = vrot.lane.b32.xlu1 %v2366_v51, %s1824_s27 }
 0x25c   : > { %1060 = vrot.lane.b32.xlu2 %v2416_v59, %s1825_s28  ;;  %1135 = vrot.lane.b32.xlu0 %v2416_v59, %s1830_s10 }
 0x25d   : > { %1090 = vrot.lane.b32.xlu1 %v2418_v10, %s1824_s27 }
 0x264   : > { %1092 = vrot.lane.b32.xlu2 %v2402_v20, %s1824_s27  ;;  %1094 = vrot.lane.b32.xlu0 %v2408_v49, %s1824_s27  ;;  %s1831_s27 = smov 80  }
 0x265   : > { %1137 = vrot.lane.b32.xlu1 %v2418_v10, %s1830_s10 }
 0x26c   : > { %1066 = vrot.lane.b32.xlu2 %v2408_v49, %s1825_s28  ;;  %1131 = vrot.lane.b32.xlu0 %v2364_v15, %s1830_s10 }
 0x26d   : > { %1064 = vrot.lane.b32.xlu1 %v2402_v20, %s1825_s28 }
 0x274   : > { %1139 = vrot.lane.b32.xlu2 %v2402_v20, %s1830_s10 }
 0x296   : > { %v1083_v1 = vpop.permute.xlu2 %1082 }
 0x29e   : > { %v2452_v2 = vpop.permute.xlu2 %1129 }
 0x2a6   : > { %v1057_v60 = vpop.permute.xlu2 %1056 }
 0x2ae   : > { %v1053_v61 = vpop.permute.xlu0 %1052  ;;  %v1089_v62 = vpop.permute.xlu2 %1088 }
 0x2af   : > { %v1081_v63 = vpop.permute.xlu1 %1080 }
 0x2b0   : > { %v1096_v14 = vsel %vm342_vm0, %v1081_v63, %v1083_v1 }
 0x2b1   : > { %1159 = vrot.lane.b32.xlu1 %v1096_v14, %s1830_s10 }
 0x2b6   : > { %v1085_v21 = vpop.permute.xlu0 %1084  ;;  %v1061_v31 = vpop.permute.xlu2 %1060 }
 0x2b7   : > { %v1055_v22 = vpop.permute.xlu1 %1054  ;;  %v2479_v8 = vsel %vm342_vm0, %v1083_v1, %v1085_v21 }
 0x2b8   : > { %v1068_v11 = vsel %vm319_vm1, %v1053_v61, %v1055_v22  ;;  %v2484_v37 = vsel %vm319_vm1, %v1055_v22, %v1057_v60  ;;  %v1785_v22 = vld [vmem:[%s2721_s4 + $0x10] sm:$0xff] }
 0x2b9   : > { %1143 = vrot.lane.b32.xlu2 %v1068_v11, %s1830_s10 }
 0x2be   : > { %v2458_v30 = vpop.permute.xlu0 %1058  ;;  %v1093_v25 = vpop.permute.xlu2 %1092 }
 0x2bf   : > { %v1128_v0 = vpop.permute.xlu1 %1127  ;;  %1149 = vrot.lane.b32.xlu1 %v2458_v30, %s1830_s10  ;;  %v2468_v12 = vsel %vm319_vm1, %v1057_v60, %v2458_v30 }
 0x2c0   : > { %v2464_v24 = vsel %vm1175_vm11, %v1128_v0, %v2452_v2 }
 0x2c6   : > { %v1063_v33 = vpop.permute.xlu0 %1062  ;;  %v1067_v7 = vpop.permute.xlu2 %1066 }
 0x2c7   : > { %v1087_v32 = vpop.permute.xlu1 %1086  ;;  %1147 = vrot.lane.b32.xlu1 %v2468_v12, %s1830_s10  ;;  %v1071_v43 = vsel %vm319_vm1, %v1061_v31, %v1063_v33 }
 0x2c8   : > { %1165 = vrot.lane.b32.xlu2 %v1087_v32, %s1830_s10  ;;  %v2474_v26 = vsel %vm342_vm0, %v1085_v21, %v1087_v32 }
 0x2c9   : > { %1163 = vrot.lane.b32.xlu0 %v2474_v26, %s1830_s10 }
 0x2ce   : > { %v1136_v34 = vpop.permute.xlu0 %1135  ;;  %v2490_v38 = vpop.permute.xlu2 %1139 }
 0x2cf   : > { %v1091_v36 = vpop.permute.xlu1 %1090 }
 0x2d0   : > { %1161 = vrot.lane.b32.xlu2 %v2479_v8, %s1830_s10  ;;  %v1099_v13 = vsel %vm342_vm0, %v1089_v62, %v1091_v36  ;;  %v2493_v17 = vsel %vm342_vm0, %v1091_v36, %v1093_v25 }
 0x2d1   : > { %1145 = vrot.lane.b32.xlu0 %v2484_v37, %s1830_s10  ;;  %1167 = vrot.lane.b32.xlu1 %v1099_v13, %s1830_s10 }
 0x2d2   : > { %1293 = vmatpush.bf16.msrb.mxu3 %v1099_v13 }
 0x2d6   : > { %1294 = vmatpush.bf16.msrb.mxu3 %v1096_v14  ;;  %v1095_v23 = vpop.permute.xlu0 %1094 }
 0x2d7   : > { %v1138_v41 = vpop.permute.xlu1 %1137  ;;  %v2508_v42 = vsel %vm342_vm0, %v1093_v25, %v1095_v23 }
 0x2d8   : > { %1169 = vrot.lane.b32.xlu2 %v2493_v17, %s1830_s10  ;;  %v2499_v16 = vsel %vm1175_vm11, %v1136_v34, %v1138_v41  ;;  %v2503_v35 = vsel %vm1175_vm11, %v1138_v41, %v2490_v38  ;;  %v1786_v41 = vld [vmem:[%s2721_s4 + $0x18] sm:$0xff] }
 0x2d9   : > { %1157 = vrot.lane.b32.xlu0 %v1067_v7, %s1830_s10  ;;  %1151 = vrot.lane.b32.xlu1 %v1071_v43, %s1830_s10 }
 0x2da   : > { %1295 = vmatpush.bf16.msrb.mxu3 %v1071_v43 }
 0x2de   : > { %1296 = vmatpush.bf16.msrb.mxu3 %v1068_v11  ;;  %v2579_v47 = vpop.permute.xlu0 %1131 }
 0x2df   : > { %v1065_v5 = vpop.permute.xlu1 %1064 }
 0x2e0   : > { %v2511_v18 = vsel %vm319_vm1, %v1063_v33, %v1065_v5  ;;  %v2521_v39 = vsel %vm319_vm1, %v1065_v5, %v1067_v7 }
 0x2e1   : > { %1171 = vrot.lane.b32.xlu0 %v2508_v42, %s1830_s10  ;;  %1173 = vrot.lane.b32.xlu1 %v1095_v23, %s1830_s10 }
 0x2e2   : > { %1297 = vmatpush.bf16.msrb.mxu3 %v2416_v59  ;;  %1153 = vrot.lane.b32.xlu2 %v2511_v18, %s1830_s10 }
 0x2e6   : > { %1298 = vmatpush.bf16.msrb.mxu3 %v2380_v4 }
 0x2e9   : > { %1403 = vrot.lane.b32.xlu1 %v1099_v13, %s1831_s27  ;;  %1155 = vrot.lane.b32.xlu0 %v2521_v39, %s1830_s10 }
 0x2ea   : > { %1141 = vrot.lane.b32.xlu2 %v2408_v49, %s1830_s10 }
 0x2f1   : > { %1395 = vrot.lane.b32.xlu1 %v1096_v14, %s1831_s27  ;;  %1133 = vrot.lane.b32.xlu0 %v2366_v51, %s1830_s10  ;;  %s1796_s10 = smul.u32 96, %s2733_s22 }
 0x2f2   : > { %1397 = vrot.lane.b32.xlu2 %v2479_v8, %s1831_s27 }
 0x2f3   : > { %s2698_s11 = scalar_lea.vmem %s2723_s6, %s1796_s10 }
 0x2f9   : > { %1387 = vrot.lane.b32.xlu1 %v1071_v43, %s1831_s27  ;;  %1399 = vrot.lane.b32.xlu0 %v2474_v26, %s1831_s27 }
 0x2fa   : > { %1381 = vrot.lane.b32.xlu2 %v2484_v37, %s1831_s27 }
 0x301   : > { %1379 = vrot.lane.b32.xlu1 %v1068_v11, %s1831_s27  ;;  %1383 = vrot.lane.b32.xlu0 %v2468_v12, %s1831_s27 }
 0x302   : > { %1405 = vrot.lane.b32.xlu2 %v2493_v17, %s1831_s27 }
 0x309   : > { %1371 = vrot.lane.b32.xlu1 %v2416_v59, %s1831_s27  ;;  %1407 = vrot.lane.b32.xlu0 %v2508_v42, %s1831_s27  ;;  %v2597_v59 = vld [vmem:[%s2721_s4 + $0x8] sm:$0xff] }
 0x30a   : > { %1389 = vrot.lane.b32.xlu2 %v2511_v18, %s1831_s27 }
 0x311   : > { %1363 = vrot.lane.b32.xlu1 %v2380_v4, %s1831_s27  ;;  %1391 = vrot.lane.b32.xlu0 %v2521_v39, %s1831_s27 }
 0x312   : > { %1373 = vrot.lane.b32.xlu2 %v2418_v10, %s1831_s27 }
 0x313   : > { %v1144_v6 = vpop.permute.xlu2 %1143 }
 0x319   : > { %1409 = vrot.lane.b32.xlu1 %v1095_v23, %s1831_s27  ;;  %1375 = vrot.lane.b32.xlu0 %v2402_v20, %s1831_s27 }
 0x31a   : > { %1365 = vrot.lane.b32.xlu2 %v2382_v3, %s1831_s27 }
 0x321   : > { %1385 = vrot.lane.b32.xlu1 %v2458_v30, %s1831_s27  ;;  %1367 = vrot.lane.b32.xlu0 %v2364_v15, %s1831_s27 }
 0x322   : > { %1401 = vrot.lane.b32.xlu2 %v1087_v32, %s1831_s27  ;;  %v1166_v4 = vpop.permute.xlu2 %1165 }
 0x323   : > { %v1160_v28 = vpop.permute.xlu1 %1159 }
 0x329   : > { %1525 = vperm.xlu1 %1813, %v259_v27   ;;  %1393 = vrot.lane.b32.xlu0 %v1067_v7, %s1831_s27 }
 0x32a   : > { %1377 = vrot.lane.b32.xlu2 %v2408_v49, %s1831_s27  ;;  %v1162_v44 = vpop.permute.xlu2 %1161  ;;  %v2587_v49 = vld [vmem:[%s2721_s4] sm:$0xff] }
 0x32b   : > { %1743 = vmatmul.msk.bf16.vlgmr.msrb.gmra.mxu3 %vm459_vm3, %v2587_v49  ;;  %v1188_v55 = vsel %vm1175_vm11, %v1160_v28, %v1162_v44 }
 0x331   : > { %1540 = vperm.xlu1 %1813, %v262_v45   ;;  %1369 = vrot.lane.b32.xlu0 %v2366_v51, %s1831_s27  ;;  %v1150_v40 = vpop.permute.xlu1 %1149 }
 0x332   : > { %1530 = vperm.xlu2 %1814, %v260_v19   ;;  %v1170_v46 = vpop.permute.xlu2 %1169 }
 0x339   : > { %1535 = vperm.xlu0 %1815, %v261_v9   ;;  %v1148_v29 = vpop.permute.xlu1 %1147 }
 0x33a   : > { %v1184_v33 = vsel %vm1175_vm11, %v1148_v29, %v1150_v40 }
 0x33b   : > { %v1164_v48 = vpop.permute.xlu0 %1163  ;;  %1744 = vmatmul.msk.bf16.gmra.mxu3 %vm459_vm3, %v2597_v59 }
 0x33c   : > { %v1154_v50 = vpop.permute.xlu2 %1153  ;;  %v1189_v21 = vsel %vm1175_vm11, %v1162_v44, %v1164_v48  ;;  %v1190_v11 = vsel %vm1175_vm11, %v1164_v48, %v1166_v4 }
 0x343   : > { %v1146_v51 = vpop.permute.xlu0 %1145  ;;  %v1168_v52 = vpop.permute.xlu1 %1167 }
 0x344   : > { %v1191_v53 = vsel %vm1175_vm11, %v1168_v52, %v1170_v46  ;;  %v1142_v54 = vpop.permute.xlu2 %1141  ;;  %v1182_v60 = vsel %vm1175_vm11, %v1144_v6, %v1146_v51 }
 0x345   : > { %1220 = vmatpush.bf16.msrb.mxu0 %v1191_v53  ;;  %v1181_v34 = vsel %vm1175_vm11, %v2490_v38, %v1142_v54 }
 0x349   : > { %1221 = vmatpush.bf16.msrb.mxu0 %v1188_v55 }
 0x34b   : > { %v1158_v56 = vpop.permute.xlu0 %1157  ;;  %v1152_v57 = vpop.permute.xlu1 %1151 }
 0x34c   : > { %v1185_v58 = vsel %vm1175_vm11, %v1152_v57, %v1154_v50  ;;  %v2599_v1 = vpop.permute.xlu2 %1397 }
 0x34d   : > { %1222 = vmatpush.bf16.msrb.mxu0 %v1185_v58 }
 0x351   : > { %1223 = vmatpush.bf16.msrb.mxu0 %v1182_v60 }
 0x353   : > { %v1172_v61 = vpop.permute.xlu0 %1171  ;;  %v1174_v62 = vpop.permute.xlu1 %1173 }
 0x354   : > { %v1192_v63 = vsel %vm1175_vm11, %v1170_v46, %v1172_v61  ;;  %v1193_v14 = vsel %vm1175_vm11, %v1172_v61, %v1174_v62  ;;  %v2613_v31 = vpop.permute.xlu2 %1381 }
 0x355   : > { %1224 = vmatpush.bf16.msrb.mxu0 %v2499_v16  ;;  %1239 = vmatpush.bf16.msrb.mxu1 %v1192_v63 }
 0x356   : > { %1258 = vmatpush.bf16.msrb.mxu2 %v1193_v14 }
 0x359   : > { %1225 = vmatpush.bf16.msrb.mxu0 %v2464_v24  ;;  %1240 = vmatpush.bf16.msrb.mxu1 %v1189_v21  ;;  %v1183_v24 = vsel %vm1175_vm11, %v1146_v51, %v1148_v29 }
 0x35a   : > { %1259 = vmatpush.bf16.msrb.mxu2 %v1190_v11 }
 0x35b   : > { %v1156_v30 = vpop.permute.xlu0 %1155  ;;  %v1404_v0 = vpop.permute.xlu1 %1403 }
 0x35c   : > { %1729 = vmatmul.msk.bf16.vlgmr.msrb.gmra.mxu0 %vm459_vm3, %v1785_v22  ;;  %v1186_v25 = vsel %vm1175_vm11, %v1154_v50, %v1156_v30  ;;  %v1187_v32 = vsel %vm1175_vm11, %v1156_v30, %v1158_v56  ;;  %v1406_v13 = vpop.permute.xlu2 %1405  ;;  %v1788_v50 = vld [vmem:[%s2721_s4 + $0x28] sm:$0xff] }
 0x35d   : > { %1312 = vmatpush.bf16.msra.mxu0 %v2493_v17  ;;  %1241 = vmatpush.bf16.msrb.mxu1 %v1186_v25  ;;  %v1427_v43 = vsel %vm1411_vm12, %v1404_v0, %v1406_v13 }
 0x35e   : > { %1260 = vmatpush.bf16.msrb.mxu2 %v1187_v32 }
 0x361   : > { %1313 = vmatpush.bf16.msra.mxu0 %v2479_v8  ;;  %1242 = vmatpush.bf16.msrb.mxu1 %v1183_v24  ;;  %v1177_v8 = vsel %vm1175_vm11, %v2452_v2, %v2579_v47 }
 0x362   : > { %1261 = vmatpush.bf16.msrb.mxu2 %v1184_v33 }
 0x363   : > { %v1134_v7 = vpop.permute.xlu0 %1133  ;;  %v1396_v36 = vpop.permute.xlu1 %1395 }
 0x364   : > { %v1178_v17 = vsel %vm1175_vm11, %v2579_v47, %v1134_v7  ;;  %v1390_v2 = vpop.permute.xlu2 %1389  ;;  %v1424_v16 = vsel %vm1411_vm12, %v1396_v36, %v2599_v1 }
 0x365   : > { %1314 = vmatpush.bf16.msra.mxu0 %v2511_v18  ;;  %1243 = vmatpush.bf16.msrb.mxu1 %v2503_v35 }
 0x366   : > { %1262 = vmatpush.bf16.msrb.mxu2 %v1181_v34 }
 0x369   : > { %1315 = vmatpush.bf16.msra.mxu0 %v2484_v37  ;;  %1244 = vmatpush.bf16.msrb.mxu1 %v1177_v8 }
 0x36a   : > { %1263 = vmatpush.bf16.msrb.mxu2 %v1178_v17 }
 0x36b   : > { %v1400_v37 = vpop.permute.xlu0 %1399  ;;  %v1388_v38 = vpop.permute.xlu1 %1387 }
 0x36c   : > { %1730 = vmatmul.msk.bf16.gmra.mxu0 %vm459_vm3, %v1786_v41  ;;  %1731 = vmatmul.msk.bf16.vlgmr.msrb.gmra.mxu1 %vm459_vm3, %v1785_v22 }
 0x36d   : > { %1316 = vmatpush.bf16.msra.mxu0 %v2418_v10  ;;  %1331 = vmatpush.bf16.msra.mxu1 %v2508_v42  ;;  %v1421_v10 = vsel %vm1411_vm12, %v1388_v38, %v1390_v2 }
 0x36e   : > { %1456 = vmatpush.bf16.msra.mxu2 %v1427_v43 }
 0x36f   : > { %1733 = vmatmul.msk.bf16.vlgmr.msrb.gmra.mxu2 %vm459_vm3, %v1785_v22 }
 0x371   : > { %1317 = vmatpush.bf16.msra.mxu0 %v2382_v3  ;;  %1332 = vmatpush.bf16.msra.mxu1 %v2474_v26  ;;  %v1374_v3 = vpop.permute.xlu2 %1373 }
 0x372   : > { %1457 = vmatpush.bf16.msra.mxu2 %v1424_v16 }
 0x373   : > { %v1384_v35 = vpop.permute.xlu0 %1383  ;;  %v1380_v23 = vpop.permute.xlu1 %1379 }
 0x374   : > { %v1418_v5 = vsel %vm1411_vm12, %v1380_v23, %v2613_v31  ;;  %v1419_v44 = vsel %vm1411_vm12, %v2613_v31, %v1384_v35 }
 0x375   : > { %1333 = vmatpush.bf16.msra.mxu1 %v2521_v39 }
 0x376   : > { %1458 = vmatpush.bf16.msra.mxu2 %v1421_v10 }
 0x379   : > { %1334 = vmatpush.bf16.msra.mxu1 %v2468_v12  ;;  %v1366_v12 = vpop.permute.xlu2 %1365 }
 0x37a   : > { %1459 = vmatpush.bf16.msra.mxu2 %v1418_v5 }
 0x37b   : > { %v1408_v42 = vpop.permute.xlu0 %1407  ;;  %v1372_v18 = vpop.permute.xlu1 %1371 }
 0x37c   : > { %v1428_v26 = vsel %vm1411_vm12, %v1406_v13, %v1408_v42  ;;  %1732 = vmatmul.msk.bf16.gmra.mxu1 %vm459_vm3, %v1786_v41  ;;  %1745 = vmatmul.msk.bf16.vlgmr.msra.gmra.mxu0 %vm459_vm3, %v2587_v49  ;;  %v1415_v39 = vsel %vm1411_vm12, %v1372_v18, %v1374_v3 }
 0x37d   : > { %1335 = vmatpush.bf16.msra.mxu1 %v2402_v20  ;;  %1475 = vmatpush.bf16.msra.mxu3 %v1428_v26  ;;  %v1425_v20 = vsel %vm1411_vm12, %v2599_v1, %v1400_v37 }
 0x37e   : > { %1460 = vmatpush.bf16.msra.mxu2 %v1415_v39 }
 0x37f   : > { %1734 = vmatmul.msk.bf16.gmra.mxu2 %vm459_vm3, %v1786_v41 }
 0x381   : > { %1336 = vmatpush.bf16.msra.mxu1 %v2364_v15  ;;  %1476 = vmatpush.bf16.msra.mxu3 %v1425_v20  ;;  %v1787_v15 = vld [vmem:[%s2721_s4 + $0x20] sm:$0xff]  ;;  %v1402_v47 = vpop.permute.xlu2 %1401 }
 0x382   : > { %v1426_v9 = vsel %vm1411_vm12, %v1400_v37, %v1402_v47 }
 0x383   : > { %v1392_v6 = vpop.permute.xlu0 %1391  ;;  %v1364_v4 = vpop.permute.xlu1 %1363 }
 0x384   : > { %v1412_v27 = vsel %vm1411_vm12, %v1364_v4, %v1366_v12  ;;  %v1422_v28 = vsel %vm1411_vm12, %v1390_v2, %v1392_v6 }
 0x385   : > { %1461 = vmatpush.bf16.msra.mxu2 %v1412_v27  ;;  %1477 = vmatpush.bf16.msra.mxu3 %v1422_v28 }
 0x389   : > { %1478 = vmatpush.bf16.msra.mxu3 %v1419_v44  ;;  %v1378_v54 = vpop.permute.xlu2 %1377 }
 0x38b   : > { %v1376_v45 = vpop.permute.xlu0 %1375  ;;  %v1410_v19 = vpop.permute.xlu1 %1409 }
 0x38c   : > { %v1429_v40 = vsel %vm1411_vm12, %v1408_v42, %v1410_v19  ;;  %1746 = vmatmul.msk.bf16.gmra.mxu0 %vm459_vm3, %v2597_v59  ;;  %1747 = vmatmul.msk.bf16.vlgmr.msra.gmra.mxu1 %vm459_vm3, %v2587_v49  ;;  %v1416_v46 = vsel %vm1411_vm12, %v1374_v3, %v1376_v45  ;;  %v1417_v55 = vsel %vm1411_vm12, %v1376_v45, %v1378_v54 }
 0x38d   : > { %1479 = vmatpush.bf16.msra.mxu3 %v1416_v46  ;;  %1494 = vmatpush.bf16.msrb.mxu0 %v1429_v40 }
 0x38e   : > { %1789 = vmatpush.bf16.msrb.mxu1 %v1429_v40 }
 0x38f   : > { %1761 = vmatmul.msk.bf16.vlgmr.msra.gmra.mxu2 %vm459_vm3, %v1787_v15 }
 0x391   : > { %1495 = vmatpush.bf16.msrb.mxu0 %v1426_v9  ;;  %v1531_v10 = vpop.permute.xlu2 %1530 }
 0x392   : > { %1790 = vmatpush.bf16.msrb.mxu1 %v1426_v9 }
 0x393   : > { %v1368_v29 = vpop.permute.xlu0 %1367  ;;  %v1386_v52 = vpop.permute.xlu1 %1385 }
 0x394   : > { %v1413_v48 = vsel %vm1411_vm12, %v1366_v12, %v1368_v29  ;;  %v1420_v53 = vsel %vm1411_vm12, %v1384_v35, %v1386_v52 }
 0x395   : > { %1480 = vmatpush.bf16.msra.mxu3 %v1413_v48 }
 0x398   : > { %1763 = vmatmul.msk.bf16.vlgmr.msra.gmra.mxu3 %vm459_vm3, %v1787_v15 }
 0x39b   : > { %v1394_v49 = vpop.permute.xlu0 %1393  ;;  %v1526_v8 = vpop.permute.xlu1 %1525 }
 0x39c   : > { %1748 = vmatmul.msk.bf16.gmra.mxu1 %vm459_vm3, %v2597_v59  ;;  %v1423_v51 = vsel %vm1411_vm12, %v1392_v6, %v1394_v49 }
 0x39d   : > { %1496 = vmatpush.bf16.msrb.mxu0 %v1423_v51  ;;  %1791 = vmatpush.bf16.msrb.mxu1 %v1423_v51 }
 0x39f   : > { %1762 = vmatmul.msk.bf16.gmra.mxu2 %vm459_vm3, %v1788_v50 }
 0x3a1   : > { %1497 = vmatpush.bf16.msrb.mxu0 %v1420_v53  ;;  %1792 = vmatpush.bf16.msrb.mxu1 %v1420_v53 }
 0x3a3   : > { %v1370_v56 = vpop.permute.xlu0 %1369 }
 0x3a4   : > { %v1414_v57 = vsel %vm1411_vm12, %v1368_v29, %v1370_v56  ;;  %v1541_v29 = vpop.permute.xlu1 %1540 }
 0x3a5   : > { %1498 = vmatpush.bf16.msrb.mxu0 %v1417_v55  ;;  %1793 = vmatpush.bf16.msrb.mxu1 %v1417_v55 }
 0x3a8   : > { %1764 = vmatmul.msk.bf16.gmra.mxu3 %vm459_vm3, %v1788_v50 }
 0x3a9   : > { %1499 = vmatpush.bf16.msrb.mxu0 %v1414_v57  ;;  %1794 = vmatpush.bf16.msrb.mxu1 %v1414_v57 }
 0x3ab   : > { %v1536_v6 = vpop.permute.xlu0 %1535 }
 0x3ac   : > { %1765 = vmatmul.msk.bf16.vlgmr.msrb.gmra.mxu0 %vm459_vm3, %v1787_v15  ;;  %1766 = vmatmul.msk.bf16.vlgmr.msrb.gmra.mxu1 %vm459_vm3, %v1788_v50 }
 0x3ae   : > { %v1300_v63 = vpop.f32.mrf.mxu3 }
 0x3b6   : > { %v1302_v11 = vpop.f32.mrf.mxu3 }
 0x3be   : > { %v1305_v32 = vpop.f32.mrf.mxu3 }
 0x3c6   : > { %v1307_v41 = vpop.f32.mrf.mxu3 }
 0x3d9   : > { %v1227_v58 = vpop.f32.mrf.mxu0 }
 0x3da   : > { %v1301_v7 = vadd.f32 %v1300_v63, %v1227_v58 }
 0x3e1   : > { %v1229_v59 = vpop.f32.mrf.mxu0 }
 0x3e2   : > { %v1303_v43 = vadd.f32 %v1302_v11, %v1229_v59 }
 0x3e9   : > { %v1246_v1 = vpop.f32.mrf.mxu1  ;;  %v1232_v60 = vpop.f32.mrf.mxu0 }
 0x3ea   : > { %v1306_v18 = vadd.f32 %v1305_v32, %v1232_v60 }
 0x3f1   : > { %v1248_v62 = vpop.f32.mrf.mxu1  ;;  %v1234_v21 = vpop.f32.mrf.mxu0 }
 0x3f2   : > { %v1265_v61 = vpop.f32.mrf.mxu2  ;;  %v1308_v45 = vadd.f32 %v1307_v41, %v1234_v21 }
 0x3f9   : > { %v1251_v22 = vpop.f32.mrf.mxu1  ;;  %v1319_v0 = vpop.f32.mrf.mxu0 }
 0x3fa   : > { %v2690_v14 = vpop.f32.mrf.mxu2  ;;  %v1320_v35 = vadd.f32 %v1319_v0, %v1246_v1 }
 0x401   : > { %v2692_v30 = vpop.f32.mrf.mxu1  ;;  %v1321_v33 = vpop.f32.mrf.mxu0 }
 0x402   : > { %v1270_v31 = vpop.f32.mrf.mxu2  ;;  %v1322_v4 = vadd.f32 %v1321_v33, %v1248_v62 }
 0x409   : > { %v1338_v24 = vpop.f32.mrf.mxu1  ;;  %v1324_v37 = vpop.f32.mrf.mxu0 }
 0x40a   : > { %v1272_v25 = vpop.f32.mrf.mxu2  ;;  %v1339_v19 = vadd.f32 %v1338_v24, %v1265_v61  ;;  %v1325_v48 = vadd.f32 %v1324_v37, %v1251_v22 }
 0x411   : > { %v1340_v34 = vpop.f32.mrf.mxu1  ;;  %v1326_v39 = vpop.f32.mrf.mxu0 }
 0x412   : > { %v1463_v36 = vpop.f32.mrf.mxu2  ;;  %v1341_v58 = vadd.f32 %v1340_v34, %v2690_v14  ;;  %v1327_v60 = vadd.f32 %v1326_v39, %v2692_v30 }
 0x413   : > { %v1511_v13 = vadd.f32 %v1463_v36, %v1301_v7 }
 0x415   : > { %v1543_v17 = vadd.f32 %v1526_v8, %v1511_v13 }
 0x417   : > { %1555 = vst [vmem:[%s2698_s11] sm:$0xff] %v1543_v17 }
 0x419   : > { %v1343_v16 = vpop.f32.mrf.mxu1 }
 0x41a   : > { %v1465_v38 = vpop.f32.mrf.mxu2  ;;  %v1344_v46 = vadd.f32 %v1343_v16, %v1270_v31 }
 0x41b   : > { %v1514_v2 = vadd.f32 %v1465_v38, %v1303_v43  ;;  %v1482_v5 = vpop.f32.mrf.mxu3 }
 0x41c   : > { %v1512_v3 = vadd.f32 %v1482_v5, %v1320_v35 }
 0x41d   : > { %v1546_v23 = vadd.f32 %v1531_v10, %v1514_v2 }
 0x41e   : > { %v1544_v42 = vadd.f32 %v1526_v8, %v1512_v3 }
 0x41f   : > { %1558 = vst [vmem:[%s2698_s11 + $0x18] sm:$0xff] %v1546_v23 }
 0x420   : > { %1556 = vst [vmem:[%s2698_s11 + $0x8] sm:$0xff] %v1544_v42 }
 0x421   : > { %v1345_v12 = vpop.f32.mrf.mxu1 }
 0x422   : > { %v1468_v26 = vpop.f32.mrf.mxu2  ;;  %v1346_v59 = vadd.f32 %v1345_v12, %v1272_v25 }
 0x423   : > { %v1517_v20 = vadd.f32 %v1468_v26, %v1306_v18  ;;  %v1484_v28 = vpop.f32.mrf.mxu3 }
 0x424   : > { %v1515_v44 = vadd.f32 %v1484_v28, %v1322_v4 }
 0x425   : > { %v1549_v27 = vadd.f32 %v1536_v6, %v1517_v20 }
 0x426   : > { %v1547_v15 = vadd.f32 %v1531_v10, %v1515_v44 }
 0x427   : > { %1561 = vst [vmem:[%s2698_s11 + $0x30] sm:$0xff] %v1549_v27 }
 0x428   : > { %1559 = vst [vmem:[%s2698_s11 + $0x20] sm:$0xff] %v1547_v15 }
 0x429   : > { %v1501_v9 = vpop.f32.mrf.mxu0  ;;  %v1506_v49 = vpop.f32.mrf.mxu1 }
 0x42a   : > { %v1470_v40 = vpop.f32.mrf.mxu2  ;;  %v1513_v50 = vadd.f32 %v1501_v9, %v1339_v19  ;;  %v1519_v52 = vadd.f32 %v1506_v49, %v1344_v46 }
 0x42b   : > { %v1520_v47 = vadd.f32 %v1470_v40, %v1308_v45  ;;  %v1487_v53 = vpop.f32.mrf.mxu3 }
 0x42c   : > { %v1545_v54 = vadd.f32 %v1526_v8, %v1513_v50  ;;  %v1518_v55 = vadd.f32 %v1487_v53, %v1325_v48  ;;  %v1551_v56 = vadd.f32 %v1536_v6, %v1519_v52 }
 0x42d   : > { %v1552_v51 = vadd.f32 %v1541_v29, %v1520_v47 }
 0x42e   : > { %1557 = vst [vmem:[%s2698_s11 + $0x10] sm:$0xff] %v1545_v54  ;;  %v1550_v57 = vadd.f32 %v1536_v6, %v1518_v55 }
 0x42f   : > { %1564 = vst [vmem:[%s2698_s11 + $0x48] sm:$0xff] %v1552_v51 }
 0x430   : > { %1563 = vst [vmem:[%s2698_s11 + $0x40] sm:$0xff] %v1551_v56 }
 0x431   : > { %1562 = vst [vmem:[%s2698_s11 + $0x38] sm:$0xff] %v1550_v57  ;;  %v1503_v1 = vpop.f32.mrf.mxu0  ;;  %v1508_v62 = vpop.f32.mrf.mxu1 }
 0x432   : > { %v1516_v61 = vadd.f32 %v1503_v1, %v1341_v58  ;;  %v1522_v63 = vadd.f32 %v1508_v62, %v1346_v59 }
 0x433   : > { %v1489_v21 = vpop.f32.mrf.mxu3 }
 0x434   : > { %v1548_v22 = vadd.f32 %v1531_v10, %v1516_v61  ;;  %v1521_v11 = vadd.f32 %v1489_v21, %v1327_v60  ;;  %v1554_v31 = vadd.f32 %v1541_v29, %v1522_v63 }
 0x436   : > { %1560 = vst [vmem:[%s2698_s11 + $0x28] sm:$0xff] %v1548_v22  ;;  %v1553_v0 = vadd.f32 %v1541_v29, %v1521_v11 }
 0x437   : > { %1566 = vst [vmem:[%s2698_s11 + $0x58] sm:$0xff] %v1554_v31 }
 0x438   : > { %1565 = vst [vmem:[%s2698_s11 + $0x50] sm:$0xff] %v1553_v0 }
 0x439 PF: > { %s16_s21 = sadd.s32 1, %s1822_s21  }
 0x43a   : > { %p13_p4 = scmp.ge.s32.totalorder %s16_s21, 4  }
 0x43c   :  { %15 = sbr.rel (!%p13_p4) target bundleno = 1 (0x1), region = 78 }

</bundles_post_ra>
